<compile_context>
chip_gen: v7x
topology: tpu7x:2x2x1
jax: 0.10.0
libtpu: 0.0.40
codegen_flags: <defaults>
</compile_context>

<pallas_src>
import jax
import jax.numpy as jnp
from jax.experimental import pallas as pl
from jax.experimental.pallas import tpu as pltpu

IN_CHANNELS = 10
EMBED_DIM = 64
NUM_HEADS = 2
HEAD_DIM = EMBED_DIM // NUM_HEADS
KERNEL_SIZE = 4
LN_EPS = 1e-5


def _self_attention_block_kernel(
    x_ref,       # (Bt, L, KCp)  im2col'd + lane-padded input block
    wc_ref,      # (KCp, E)      conv weight (flattened taps, zero-padded rows)
    wqkv_ref,    # (E, 3E)       fused q/k/v projection weight (pre-transposed)
    wo_ref,      # (E, E)        out_proj weight (pre-transposed)
    vecs_ref,    # (8, E)        rows: bc, bq, bk, bv, bo, gamma, beta, 0
    o_ref,       # (Bt, L, E)
):
    Bt, L, KCp = x_ref.shape
    E = o_ref.shape[-1]
    N = Bt * L

    bc = vecs_ref[0:1, :]
    bq = vecs_ref[1:2, :]
    bk = vecs_ref[2:3, :]
    bv = vecs_ref[3:4, :]
    bo = vecs_ref[4:5, :]
    gamma = vecs_ref[5:6, :]
    beta = vecs_ref[6:7, :]

    # --- Conv1d(k=4, padding='same') as one im2col matmul over all Bt*L rows ---
    xm = x_ref[...].reshape(N, KCp)
    y = jnp.dot(xm, wc_ref[...], preferred_element_type=jnp.float32) + bc   # (N, E)

    # --- Fused QKV projection: one (N,64)@(64,192) matmul ---
    qkv = jnp.dot(y, wqkv_ref[...], preferred_element_type=jnp.float32)     # (N, 3E)
    q = qkv[:, 0:E] + bq
    k = qkv[:, E:2 * E] + bk
    v = qkv[:, 2 * E:3 * E] + bv

    # --- Multi-head self-attention; (L,L) score matmuls stay per batch elem ---
    scale = 1.0 / (HEAD_DIM ** 0.5)
    wo = wo_ref[...]
    attn_rows = []
    for b in range(Bt):
        r0 = b * L
        out_b = jnp.zeros((L, E), jnp.float32)
        for h in range(NUM_HEADS):
            c0 = h * HEAD_DIM
            qh = q[r0:r0 + L, c0:c0 + HEAD_DIM]
            kh = k[r0:r0 + L, c0:c0 + HEAD_DIM]
            vh = v[r0:r0 + L, c0:c0 + HEAD_DIM]
            s = jnp.dot(qh, kh.T, preferred_element_type=jnp.float32) * scale   # (L, L)
            s = s - jnp.max(s, axis=-1, keepdims=True)
            p = jnp.exp(s)
            p = p * pl.reciprocal(jnp.sum(p, axis=-1, keepdims=True), approx=True)
            ho = jnp.dot(p, vh, preferred_element_type=jnp.float32)             # (L, Dh)
            # out-proj folded per head: no lane concat needed.
            out_b = out_b + jnp.dot(ho, wo[c0:c0 + HEAD_DIM, :],
                                    preferred_element_type=jnp.float32)
        attn_rows.append(out_b)
    attn = attn_rows[0] if Bt == 1 else jnp.concatenate(attn_rows, axis=0)      # (N, E)

    # --- Residual + LayerNorm over the embedding dim (flattened over Bt*L) ---
    z = attn + bo + y
    mu = jnp.mean(z, axis=-1, keepdims=True)
    zc = z - mu
    var = jnp.mean(zc * zc, axis=-1, keepdims=True)
    zn = zc * jax.lax.rsqrt(var + LN_EPS)
    o_ref[...] = (zn * gamma + beta).reshape(Bt, L, E)


def _pick_block_b(B):
    """Largest divisor of B that is <= 8 while keeping >= 2 grid steps (v7x)."""
    best = 1
    for bb in range(1, min(B, 8) + 1):
        if B % bb == 0 and (B == 1 or B // bb >= 2):
            best = bb
    return best


def self_attention_block(x, params, block_b=None):
    """x: (B, L, C_in) float32 -> (B, L, EMBED_DIM) float32."""
    # TODO(synk): the PyTorch module's 2-D (unbatched) input branch is not
    # implemented; only the batched 3-D path is supported here.
    B, L, Cin = x.shape
    assert Cin == IN_CHANNELS
    if block_b is None:
        block_b = _pick_block_b(B)
    assert B % block_b == 0
    grid_b = B // block_b

    # PyTorch Conv1d padding='same' with k=4, d=1: total pad 3 -> left 1, right 2.
    x_pad = jnp.pad(x, ((0, 0), (1, 2), (0, 0)))
    # im2col in XLA: (B, L, K*Cin), column order j*Cin + c.
    x_unf = jnp.concatenate(
        [x_pad[:, j:j + L, :] for j in range(KERNEL_SIZE)], axis=-1)
    KC = KERNEL_SIZE * Cin
    KCp = ((KC + 63) // 64) * 64          # lane-pad 40 -> 64
    x_unf = jnp.pad(x_unf, ((0, 0), (0, 0), (0, KCp - KC)))

    # Packed parameters (4 weight/vector refs instead of 13).
    wc_flat = params["wc"].reshape(KC, EMBED_DIM)
    wc_flat = jnp.pad(wc_flat, ((0, KCp - KC), (0, 0)))                      # (KCp, E)
    w_qkv = jnp.concatenate([params["wq"], params["wk"], params["wv"]], axis=1)  # (E, 3E)
    w_out = params["wo"]                                                     # (E, E)
    vecs = jnp.concatenate(
        [params["bc"], params["bq"], params["bk"], params["bv"],
         params["bo"], params["gamma"], params["beta"],
         jnp.zeros((1, EMBED_DIM), jnp.float32)], axis=0)                    # (8, E)

    in_specs = [
        pl.BlockSpec((block_b, L, KCp), lambda i: (i, 0, 0)),                # x_unf
        pl.BlockSpec((KCp, EMBED_DIM), lambda i: (0, 0)),                    # wc_flat
        pl.BlockSpec((EMBED_DIM, 3 * EMBED_DIM), lambda i: (0, 0)),          # w_qkv
        pl.BlockSpec((EMBED_DIM, EMBED_DIM), lambda i: (0, 0)),              # w_out
        pl.BlockSpec((8, EMBED_DIM), lambda i: (0, 0)),                      # vecs
    ]
    out_spec = pl.BlockSpec((block_b, L, EMBED_DIM), lambda i: (i, 0, 0))

    return pl.pallas_call(
        _self_attention_block_kernel,
        out_shape=jax.ShapeDtypeStruct((B, L, EMBED_DIM), jnp.float32),
        grid=(grid_b,),
        in_specs=in_specs,
        out_specs=out_spec,
        compiler_params=pltpu.CompilerParams(dimension_semantics=("parallel",)),
    )(x_unf, wc_flat, w_qkv, w_out, vecs)


def make_params(key):
    ks = jax.random.split(key, 10)
    s = 0.1
    return {
        "wc": s * jax.random.normal(ks[0], (KERNEL_SIZE, IN_CHANNELS, EMBED_DIM), jnp.float32),
        "bc": s * jax.random.normal(ks[1], (1, EMBED_DIM), jnp.float32),
        "wq": s * jax.random.normal(ks[2], (EMBED_DIM, EMBED_DIM), jnp.float32),
        "wk": s * jax.random.normal(ks[3], (EMBED_DIM, EMBED_DIM), jnp.float32),
        "wv": s * jax.random.normal(ks[4], (EMBED_DIM, EMBED_DIM), jnp.float32),
        "bq": s * jax.random.normal(ks[5], (1, EMBED_DIM), jnp.float32),
        "bk": s * jax.random.normal(ks[6], (1, EMBED_DIM), jnp.float32),
        "bv": s * jax.random.normal(ks[7], (1, EMBED_DIM), jnp.float32),
        "wo": s * jax.random.normal(ks[8], (EMBED_DIM, EMBED_DIM), jnp.float32),
        "bo": s * jax.random.normal(ks[9], (1, EMBED_DIM), jnp.float32),
        "gamma": jnp.ones((1, EMBED_DIM), jnp.float32),
        "beta": jnp.zeros((1, EMBED_DIM), jnp.float32),
    }


def ref_forward(x, p):
    """Pure-JAX reference mirroring the PyTorch forward semantics."""
    B, L, _ = x.shape
    xp = jnp.pad(x, ((0, 0), (1, 2), (0, 0)))
    y = jnp.zeros((B, L, EMBED_DIM), jnp.float32)
    for j in range(KERNEL_SIZE):
        y = y + jnp.einsum("blc,ce->ble", xp[:, j:j + L], p["wc"][j])
    y = y + p["bc"][None]
    q = y @ p["wq"] + p["bq"][None]
    k = y @ p["wk"] + p["bk"][None]
    v = y @ p["wv"] + p["bv"][None]
    qh = q.reshape(B, L, NUM_HEADS, HEAD_DIM).transpose(0, 2, 1, 3)
    kh = k.reshape(B, L, NUM_HEADS, HEAD_DIM).transpose(0, 2, 1, 3)
    vh = v.reshape(B, L, NUM_HEADS, HEAD_DIM).transpose(0, 2, 1, 3)
    s = jnp.einsum("bhqd,bhkd->bhqk", qh, kh) / (HEAD_DIM ** 0.5)
    pr = jax.nn.softmax(s, axis=-1)
    oh = jnp.einsum("bhqk,bhkd->bhqd", pr, vh)
    attn = oh.transpose(0, 2, 1, 3).reshape(B, L, EMBED_DIM)
    attn = attn @ p["wo"] + p["bo"][None]
    z = attn + y
    mu = z.mean(-1, keepdims=True)
    var = ((z - mu) ** 2).mean(-1, keepdims=True)
    return (z - mu) / jnp.sqrt(var + LN_EPS) * p["gamma"][None] + p["beta"][None]


if __name__ == "__main__":
    B, L = 8, 16
    key = jax.random.PRNGKey(0)
    kx, kp = jax.random.split(key)
    x = jax.random.normal(kx, (B, L, IN_CHANNELS), jnp.float32)
    params = make_params(kp)

    out = jax.block_until_ready(self_attention_block(x, params))
    ref = jax.block_until_ready(ref_forward(x, params))

    assert out.shape == (B, L, EMBED_DIM)
    assert jnp.allclose(out, ref, rtol=2e-3, atol=2e-3), \
        f"max abs diff {jnp.max(jnp.abs(out - ref))}"
    print("KERNEL_OK")
</pallas_src>

<mosaic_0001>
module attributes {stable_mosaic.version = 11 : i64} {
  func.func @_self_attention_block_kernel(%arg0: i32, %arg1: memref<4x16x64xf32, #tpu.memory_space<vmem>>, %arg2: memref<64x64xf32, #tpu.memory_space<vmem>>, %arg3: memref<64x192xf32, #tpu.memory_space<vmem>>, %arg4: memref<64x64xf32, #tpu.memory_space<vmem>>, %arg5: memref<8x64xf32, #tpu.memory_space<vmem>>, %arg6: memref<4x16x64xf32, #tpu.memory_space<vmem>>) attributes {dimension_semantics = [#tpu.dimension_semantics<parallel>], iteration_bounds = array<i64: 2>, scalar_prefetch = 0 : i64, scratch_operands = 0 : i64, tpu.core_type = #tpu.core_type<tc>, window_params = [{transform_indices = @transform_0, window_bounds = array<i64: 4, 16, 64>}, {pipeline_mode = #tpu.pipeline_mode<synchronous>, transform_indices = @transform_1, window_bounds = array<i64: 64, 64>}, {pipeline_mode = #tpu.pipeline_mode<synchronous>, transform_indices = @transform_2, window_bounds = array<i64: 64, 192>}, {pipeline_mode = #tpu.pipeline_mode<synchronous>, transform_indices = @transform_3, window_bounds = array<i64: 64, 64>}, {pipeline_mode = #tpu.pipeline_mode<synchronous>, transform_indices = @transform_4, window_bounds = array<i64: 8, 64>}, {transform_indices = @transform_5, window_bounds = array<i64: 4, 16, 64>}]} {
    %c0 = arith.constant 0 : index
    %c0_0 = arith.constant 0 : index
    %0 = vector.load %arg5[%c0, %c0_0] : memref<8x64xf32, #tpu.memory_space<vmem>>, vector<1x64xf32>
    %c1 = arith.constant 1 : index
    %c0_1 = arith.constant 0 : index
    %1 = vector.load %arg5[%c1, %c0_1] : memref<8x64xf32, #tpu.memory_space<vmem>>, vector<1x64xf32>
    %c2 = arith.constant 2 : index
    %c0_2 = arith.constant 0 : index
    %2 = vector.load %arg5[%c2, %c0_2] : memref<8x64xf32, #tpu.memory_space<vmem>>, vector<1x64xf32>
    %c3 = arith.constant 3 : index
    %c0_3 = arith.constant 0 : index
    %3 = vector.load %arg5[%c3, %c0_3] : memref<8x64xf32, #tpu.memory_space<vmem>>, vector<1x64xf32>
    %c4 = arith.constant 4 : index
    %c0_4 = arith.constant 0 : index
    %4 = vector.load %arg5[%c4, %c0_4] : memref<8x64xf32, #tpu.memory_space<vmem>>, vector<1x64xf32>
    %c5 = arith.constant 5 : index
    %c0_5 = arith.constant 0 : index
    %5 = vector.load %arg5[%c5, %c0_5] : memref<8x64xf32, #tpu.memory_space<vmem>>, vector<1x64xf32>
    %c6 = arith.constant 6 : index
    %c0_6 = arith.constant 0 : index
    %6 = vector.load %arg5[%c6, %c0_6] : memref<8x64xf32, #tpu.memory_space<vmem>>, vector<1x64xf32>
    %c0_7 = arith.constant 0 : index
    %c0_8 = arith.constant 0 : index
    %c0_9 = arith.constant 0 : index
    %7 = vector.load %arg1[%c0_7, %c0_8, %c0_9] : memref<4x16x64xf32, #tpu.memory_space<vmem>>, vector<4x16x64xf32>
    %8 = vector.shape_cast %7 : vector<4x16x64xf32> to vector<64x64xf32>
    %c0_10 = arith.constant 0 : index
    %c0_11 = arith.constant 0 : index
    %9 = vector.load %arg2[%c0_10, %c0_11] : memref<64x64xf32, #tpu.memory_space<vmem>>, vector<64x64xf32>
    %cst = arith.constant dense<0.000000e+00> : vector<64x64xf32>
    %10 = tpu.matmul %8, %9, %cst {dimension_numbers = #tpu.dot_dimension_numbers<[1], [0], [0], [1], [0, 0, 1, 1], [], []>} : vector<64x64xf32>, vector<64x64xf32>, vector<64x64xf32> -> vector<64x64xf32>
    %11 = vector.broadcast %0 : vector<1x64xf32> to vector<64x64xf32>
    %12 = arith.addf %10, %11 : vector<64x64xf32>
    %c0_12 = arith.constant 0 : index
    %c0_13 = arith.constant 0 : index
    %13 = vector.load %arg3[%c0_12, %c0_13] : memref<64x192xf32, #tpu.memory_space<vmem>>, vector<64x192xf32>
    %cst_14 = arith.constant dense<0.000000e+00> : vector<64x192xf32>
    %14 = tpu.matmul %12, %13, %cst_14 {dimension_numbers = #tpu.dot_dimension_numbers<[1], [0], [0], [1], [0, 0, 1, 1], [], []>} : vector<64x64xf32>, vector<64x192xf32>, vector<64x192xf32> -> vector<64x192xf32>
    %15 = vector.extract_strided_slice %14 {offsets = [0, 0], sizes = [64, 64], strides = [1, 1]} : vector<64x192xf32> to vector<64x64xf32>
    %16 = vector.broadcast %1 : vector<1x64xf32> to vector<64x64xf32>
    %17 = arith.addf %15, %16 : vector<64x64xf32>
    %18 = vector.extract_strided_slice %14 {offsets = [0, 64], sizes = [64, 64], strides = [1, 1]} : vector<64x192xf32> to vector<64x64xf32>
    %19 = vector.broadcast %2 : vector<1x64xf32> to vector<64x64xf32>
    %20 = arith.addf %18, %19 : vector<64x64xf32>
    %21 = vector.extract_strided_slice %14 {offsets = [0, 128], sizes = [64, 64], strides = [1, 1]} : vector<64x192xf32> to vector<64x64xf32>
    %22 = vector.broadcast %3 : vector<1x64xf32> to vector<64x64xf32>
    %23 = arith.addf %21, %22 : vector<64x64xf32>
    %c0_15 = arith.constant 0 : index
    %c0_16 = arith.constant 0 : index
    %24 = vector.load %arg4[%c0_15, %c0_16] : memref<64x64xf32, #tpu.memory_space<vmem>>, vector<64x64xf32>
    %cst_17 = arith.constant 0.000000e+00 : f32
    %25 = vector.broadcast %cst_17 : f32 to vector<16x64xf32>
    %26 = vector.extract_strided_slice %17 {offsets = [0, 0], sizes = [16, 32], strides = [1, 1]} : vector<64x64xf32> to vector<16x32xf32>
    %27 = vector.extract_strided_slice %20 {offsets = [0, 0], sizes = [16, 32], strides = [1, 1]} : vector<64x64xf32> to vector<16x32xf32>
    %28 = vector.extract_strided_slice %23 {offsets = [0, 0], sizes = [16, 32], strides = [1, 1]} : vector<64x64xf32> to vector<16x32xf32>
    %29 = tpu.transpose %27, [1, 0] : vector<16x32xf32> -> vector<32x16xf32>
    %cst_18 = arith.constant dense<0.000000e+00> : vector<16x16xf32>
    %30 = tpu.matmul %26, %29, %cst_18 {dimension_numbers = #tpu.dot_dimension_numbers<[1], [0], [0], [1], [0, 0, 1, 1], [], []>} : vector<16x32xf32>, vector<32x16xf32>, vector<16x16xf32> -> vector<16x16xf32>
    %cst_19 = arith.constant 0.176776692 : f32
    %31 = vector.broadcast %cst_19 : f32 to vector<16x16xf32>
    %32 = arith.mulf %30, %31 : vector<16x16xf32>
    %cst_20 = arith.constant dense<0xFF800000> : vector<16xf32>
    %33 = vector.multi_reduction <maximumf>, %32, %cst_20 [1] : vector<16x16xf32> to vector<16xf32>
    %34 = vector.shape_cast %33 : vector<16xf32> to vector<16x1xf32>
    %35 = vector.broadcast %34 : vector<16x1xf32> to vector<16x16xf32>
    %36 = arith.subf %32, %35 : vector<16x16xf32>
    %37 = math.exp %36 : vector<16x16xf32>
    %cst_21 = arith.constant dense<0.000000e+00> : vector<16xf32>
    %38 = vector.multi_reduction <add>, %37, %cst_21 [1] : vector<16x16xf32> to vector<16xf32>
    %39 = vector.shape_cast %38 : vector<16xf32> to vector<16x1xf32>
    %40 = tpu.reciprocal %39 {approx = true} : vector<16x1xf32> -> vector<16x1xf32>
    %41 = vector.broadcast %40 : vector<16x1xf32> to vector<16x16xf32>
    %42 = arith.mulf %37, %41 : vector<16x16xf32>
    %cst_22 = arith.constant dense<0.000000e+00> : vector<16x32xf32>
    %43 = tpu.matmul %42, %28, %cst_22 {dimension_numbers = #tpu.dot_dimension_numbers<[1], [0], [0], [1], [0, 0, 1, 1], [], []>} : vector<16x16xf32>, vector<16x32xf32>, vector<16x32xf32> -> vector<16x32xf32>
    %44 = vector.extract_strided_slice %24 {offsets = [0, 0], sizes = [32, 64], strides = [1, 1]} : vector<64x64xf32> to vector<32x64xf32>
    %cst_23 = arith.constant dense<0.000000e+00> : vector<16x64xf32>
    %45 = tpu.matmul %43, %44, %cst_23 {dimension_numbers = #tpu.dot_dimension_numbers<[1], [0], [0], [1], [0, 0, 1, 1], [], []>} : vector<16x32xf32>, vector<32x64xf32>, vector<16x64xf32> -> vector<16x64xf32>
    %46 = arith.addf %25, %45 : vector<16x64xf32>
    %47 = vector.extract_strided_slice %17 {offsets = [0, 32], sizes = [16, 32], strides = [1, 1]} : vector<64x64xf32> to vector<16x32xf32>
    %48 = vector.extract_strided_slice %20 {offsets = [0, 32], sizes = [16, 32], strides = [1, 1]} : vector<64x64xf32> to vector<16x32xf32>
    %49 = vector.extract_strided_slice %23 {offsets = [0, 32], sizes = [16, 32], strides = [1, 1]} : vector<64x64xf32> to vector<16x32xf32>
    %50 = tpu.transpose %48, [1, 0] : vector<16x32xf32> -> vector<32x16xf32>
    %cst_24 = arith.constant dense<0.000000e+00> : vector<16x16xf32>
    %51 = tpu.matmul %47, %50, %cst_24 {dimension_numbers = #tpu.dot_dimension_numbers<[1], [0], [0], [1], [0, 0, 1, 1], [], []>} : vector<16x32xf32>, vector<32x16xf32>, vector<16x16xf32> -> vector<16x16xf32>
    %cst_25 = arith.constant 0.176776692 : f32
    %52 = vector.broadcast %cst_25 : f32 to vector<16x16xf32>
    %53 = arith.mulf %51, %52 : vector<16x16xf32>
    %cst_26 = arith.constant dense<0xFF800000> : vector<16xf32>
    %54 = vector.multi_reduction <maximumf>, %53, %cst_26 [1] : vector<16x16xf32> to vector<16xf32>
    %55 = vector.shape_cast %54 : vector<16xf32> to vector<16x1xf32>
    %56 = vector.broadcast %55 : vector<16x1xf32> to vector<16x16xf32>
    %57 = arith.subf %53, %56 : vector<16x16xf32>
    %58 = math.exp %57 : vector<16x16xf32>
    %cst_27 = arith.constant dense<0.000000e+00> : vector<16xf32>
    %59 = vector.multi_reduction <add>, %58, %cst_27 [1] : vector<16x16xf32> to vector<16xf32>
    %60 = vector.shape_cast %59 : vector<16xf32> to vector<16x1xf32>
    %61 = tpu.reciprocal %60 {approx = true} : vector<16x1xf32> -> vector<16x1xf32>
    %62 = vector.broadcast %61 : vector<16x1xf32> to vector<16x16xf32>
    %63 = arith.mulf %58, %62 : vector<16x16xf32>
    %cst_28 = arith.constant dense<0.000000e+00> : vector<16x32xf32>
    %64 = tpu.matmul %63, %49, %cst_28 {dimension_numbers = #tpu.dot_dimension_numbers<[1], [0], [0], [1], [0, 0, 1, 1], [], []>} : vector<16x16xf32>, vector<16x32xf32>, vector<16x32xf32> -> vector<16x32xf32>
    %65 = vector.extract_strided_slice %24 {offsets = [32, 0], sizes = [32, 64], strides = [1, 1]} : vector<64x64xf32> to vector<32x64xf32>
    %cst_29 = arith.constant dense<0.000000e+00> : vector<16x64xf32>
    %66 = tpu.matmul %64, %65, %cst_29 {dimension_numbers = #tpu.dot_dimension_numbers<[1], [0], [0], [1], [0, 0, 1, 1], [], []>} : vector<16x32xf32>, vector<32x64xf32>, vector<16x64xf32> -> vector<16x64xf32>
    %67 = arith.addf %46, %66 : vector<16x64xf32>
    %cst_30 = arith.constant 0.000000e+00 : f32
    %68 = vector.broadcast %cst_30 : f32 to vector<16x64xf32>
    %69 = vector.extract_strided_slice %17 {offsets = [16, 0], sizes = [16, 32], strides = [1, 1]} : vector<64x64xf32> to vector<16x32xf32>
    %70 = vector.extract_strided_slice %20 {offsets = [16, 0], sizes = [16, 32], strides = [1, 1]} : vector<64x64xf32> to vector<16x32xf32>
    %71 = vector.extract_strided_slice %23 {offsets = [16, 0], sizes = [16, 32], strides = [1, 1]} : vector<64x64xf32> to vector<16x32xf32>
    %72 = tpu.transpose %70, [1, 0] : vector<16x32xf32> -> vector<32x16xf32>
    %cst_31 = arith.constant dense<0.000000e+00> : vector<16x16xf32>
    %73 = tpu.matmul %69, %72, %cst_31 {dimension_numbers = #tpu.dot_dimension_numbers<[1], [0], [0], [1], [0, 0, 1, 1], [], []>} : vector<16x32xf32>, vector<32x16xf32>, vector<16x16xf32> -> vector<16x16xf32>
    %cst_32 = arith.constant 0.176776692 : f32
    %74 = vector.broadcast %cst_32 : f32 to vector<16x16xf32>
    %75 = arith.mulf %73, %74 : vector<16x16xf32>
    %cst_33 = arith.constant dense<0xFF800000> : vector<16xf32>
    %76 = vector.multi_reduction <maximumf>, %75, %cst_33 [1] : vector<16x16xf32> to vector<16xf32>
    %77 = vector.shape_cast %76 : vector<16xf32> to vector<16x1xf32>
    %78 = vector.broadcast %77 : vector<16x1xf32> to vector<16x16xf32>
    %79 = arith.subf %75, %78 : vector<16x16xf32>
    %80 = math.exp %79 : vector<16x16xf32>
    %cst_34 = arith.constant dense<0.000000e+00> : vector<16xf32>
    %81 = vector.multi_reduction <add>, %80, %cst_34 [1] : vector<16x16xf32> to vector<16xf32>
    %82 = vector.shape_cast %81 : vector<16xf32> to vector<16x1xf32>
    %83 = tpu.reciprocal %82 {approx = true} : vector<16x1xf32> -> vector<16x1xf32>
    %84 = vector.broadcast %83 : vector<16x1xf32> to vector<16x16xf32>
    %85 = arith.mulf %80, %84 : vector<16x16xf32>
    %cst_35 = arith.constant dense<0.000000e+00> : vector<16x32xf32>
    %86 = tpu.matmul %85, %71, %cst_35 {dimension_numbers = #tpu.dot_dimension_numbers<[1], [0], [0], [1], [0, 0, 1, 1], [], []>} : vector<16x16xf32>, vector<16x32xf32>, vector<16x32xf32> -> vector<16x32xf32>
    %87 = vector.extract_strided_slice %24 {offsets = [0, 0], sizes = [32, 64], strides = [1, 1]} : vector<64x64xf32> to vector<32x64xf32>
    %cst_36 = arith.constant dense<0.000000e+00> : vector<16x64xf32>
    %88 = tpu.matmul %86, %87, %cst_36 {dimension_numbers = #tpu.dot_dimension_numbers<[1], [0], [0], [1], [0, 0, 1, 1], [], []>} : vector<16x32xf32>, vector<32x64xf32>, vector<16x64xf32> -> vector<16x64xf32>
    %89 = arith.addf %68, %88 : vector<16x64xf32>
    %90 = vector.extract_strided_slice %17 {offsets = [16, 32], sizes = [16, 32], strides = [1, 1]} : vector<64x64xf32> to vector<16x32xf32>
    %91 = vector.extract_strided_slice %20 {offsets = [16, 32], sizes = [16, 32], strides = [1, 1]} : vector<64x64xf32> to vector<16x32xf32>
    %92 = vector.extract_strided_slice %23 {offsets = [16, 32], sizes = [16, 32], strides = [1, 1]} : vector<64x64xf32> to vector<16x32xf32>
    %93 = tpu.transpose %91, [1, 0] : vector<16x32xf32> -> vector<32x16xf32>
    %cst_37 = arith.constant dense<0.000000e+00> : vector<16x16xf32>
    %94 = tpu.matmul %90, %93, %cst_37 {dimension_numbers = #tpu.dot_dimension_numbers<[1], [0], [0], [1], [0, 0, 1, 1], [], []>} : vector<16x32xf32>, vector<32x16xf32>, vector<16x16xf32> -> vector<16x16xf32>
    %cst_38 = arith.constant 0.176776692 : f32
    %95 = vector.broadcast %cst_38 : f32 to vector<16x16xf32>
    %96 = arith.mulf %94, %95 : vector<16x16xf32>
    %cst_39 = arith.constant dense<0xFF800000> : vector<16xf32>
    %97 = vector.multi_reduction <maximumf>, %96, %cst_39 [1] : vector<16x16xf32> to vector<16xf32>
    %98 = vector.shape_cast %97 : vector<16xf32> to vector<16x1xf32>
    %99 = vector.broadcast %98 : vector<16x1xf32> to vector<16x16xf32>
    %100 = arith.subf %96, %99 : vector<16x16xf32>
    %101 = math.exp %100 : vector<16x16xf32>
    %cst_40 = arith.constant dense<0.000000e+00> : vector<16xf32>
    %102 = vector.multi_reduction <add>, %101, %cst_40 [1] : vector<16x16xf32> to vector<16xf32>
    %103 = vector.shape_cast %102 : vector<16xf32> to vector<16x1xf32>
    %104 = tpu.reciprocal %103 {approx = true} : vector<16x1xf32> -> vector<16x1xf32>
    %105 = vector.broadcast %104 : vector<16x1xf32> to vector<16x16xf32>
    %106 = arith.mulf %101, %105 : vector<16x16xf32>
    %cst_41 = arith.constant dense<0.000000e+00> : vector<16x32xf32>
    %107 = tpu.matmul %106, %92, %cst_41 {dimension_numbers = #tpu.dot_dimension_numbers<[1], [0], [0], [1], [0, 0, 1, 1], [], []>} : vector<16x16xf32>, vector<16x32xf32>, vector<16x32xf32> -> vector<16x32xf32>
    %108 = vector.extract_strided_slice %24 {offsets = [32, 0], sizes = [32, 64], strides = [1, 1]} : vector<64x64xf32> to vector<32x64xf32>
    %cst_42 = arith.constant dense<0.000000e+00> : vector<16x64xf32>
    %109 = tpu.matmul %107, %108, %cst_42 {dimension_numbers = #tpu.dot_dimension_numbers<[1], [0], [0], [1], [0, 0, 1, 1], [], []>} : vector<16x32xf32>, vector<32x64xf32>, vector<16x64xf32> -> vector<16x64xf32>
    %110 = arith.addf %89, %109 : vector<16x64xf32>
    %cst_43 = arith.constant 0.000000e+00 : f32
    %111 = vector.broadcast %cst_43 : f32 to vector<16x64xf32>
    %112 = vector.extract_strided_slice %17 {offsets = [32, 0], sizes = [16, 32], strides = [1, 1]} : vector<64x64xf32> to vector<16x32xf32>
    %113 = vector.extract_strided_slice %20 {offsets = [32, 0], sizes = [16, 32], strides = [1, 1]} : vector<64x64xf32> to vector<16x32xf32>
    %114 = vector.extract_strided_slice %23 {offsets = [32, 0], sizes = [16, 32], strides = [1, 1]} : vector<64x64xf32> to vector<16x32xf32>
    %115 = tpu.transpose %113, [1, 0] : vector<16x32xf32> -> vector<32x16xf32>
    %cst_44 = arith.constant dense<0.000000e+00> : vector<16x16xf32>
    %116 = tpu.matmul %112, %115, %cst_44 {dimension_numbers = #tpu.dot_dimension_numbers<[1], [0], [0], [1], [0, 0, 1, 1], [], []>} : vector<16x32xf32>, vector<32x16xf32>, vector<16x16xf32> -> vector<16x16xf32>
    %cst_45 = arith.constant 0.176776692 : f32
    %117 = vector.broadcast %cst_45 : f32 to vector<16x16xf32>
    %118 = arith.mulf %116, %117 : vector<16x16xf32>
    %cst_46 = arith.constant dense<0xFF800000> : vector<16xf32>
    %119 = vector.multi_reduction <maximumf>, %118, %cst_46 [1] : vector<16x16xf32> to vector<16xf32>
    %120 = vector.shape_cast %119 : vector<16xf32> to vector<16x1xf32>
    %121 = vector.broadcast %120 : vector<16x1xf32> to vector<16x16xf32>
    %122 = arith.subf %118, %121 : vector<16x16xf32>
    %123 = math.exp %122 : vector<16x16xf32>
    %cst_47 = arith.constant dense<0.000000e+00> : vector<16xf32>
    %124 = vector.multi_reduction <add>, %123, %cst_47 [1] : vector<16x16xf32> to vector<16xf32>
    %125 = vector.shape_cast %124 : vector<16xf32> to vector<16x1xf32>
    %126 = tpu.reciprocal %125 {approx = true} : vector<16x1xf32> -> vector<16x1xf32>
    %127 = vector.broadcast %126 : vector<16x1xf32> to vector<16x16xf32>
    %128 = arith.mulf %123, %127 : vector<16x16xf32>
    %cst_48 = arith.constant dense<0.000000e+00> : vector<16x32xf32>
    %129 = tpu.matmul %128, %114, %cst_48 {dimension_numbers = #tpu.dot_dimension_numbers<[1], [0], [0], [1], [0, 0, 1, 1], [], []>} : vector<16x16xf32>, vector<16x32xf32>, vector<16x32xf32> -> vector<16x32xf32>
    %130 = vector.extract_strided_slice %24 {offsets = [0, 0], sizes = [32, 64], strides = [1, 1]} : vector<64x64xf32> to vector<32x64xf32>
    %cst_49 = arith.constant dense<0.000000e+00> : vector<16x64xf32>
    %131 = tpu.matmul %129, %130, %cst_49 {dimension_numbers = #tpu.dot_dimension_numbers<[1], [0], [0], [1], [0, 0, 1, 1], [], []>} : vector<16x32xf32>, vector<32x64xf32>, vector<16x64xf32> -> vector<16x64xf32>
    %132 = arith.addf %111, %131 : vector<16x64xf32>
    %133 = vector.extract_strided_slice %17 {offsets = [32, 32], sizes = [16, 32], strides = [1, 1]} : vector<64x64xf32> to vector<16x32xf32>
    %134 = vector.extract_strided_slice %20 {offsets = [32, 32], sizes = [16, 32], strides = [1, 1]} : vector<64x64xf32> to vector<16x32xf32>
    %135 = vector.extract_strided_slice %23 {offsets = [32, 32], sizes = [16, 32], strides = [1, 1]} : vector<64x64xf32> to vector<16x32xf32>
    %136 = tpu.transpose %134, [1, 0] : vector<16x32xf32> -> vector<32x16xf32>
    %cst_50 = arith.constant dense<0.000000e+00> : vector<16x16xf32>
    %137 = tpu.matmul %133, %136, %cst_50 {dimension_numbers = #tpu.dot_dimension_numbers<[1], [0], [0], [1], [0, 0, 1, 1], [], []>} : vector<16x32xf32>, vector<32x16xf32>, vector<16x16xf32> -> vector<16x16xf32>
    %cst_51 = arith.constant 0.176776692 : f32
    %138 = vector.broadcast %cst_51 : f32 to vector<16x16xf32>
    %139 = arith.mulf %137, %138 : vector<16x16xf32>
    %cst_52 = arith.constant dense<0xFF800000> : vector<16xf32>
    %140 = vector.multi_reduction <maximumf>, %139, %cst_52 [1] : vector<16x16xf32> to vector<16xf32>
    %141 = vector.shape_cast %140 : vector<16xf32> to vector<16x1xf32>
    %142 = vector.broadcast %141 : vector<16x1xf32> to vector<16x16xf32>
    %143 = arith.subf %139, %142 : vector<16x16xf32>
    %144 = math.exp %143 : vector<16x16xf32>
    %cst_53 = arith.constant dense<0.000000e+00> : vector<16xf32>
    %145 = vector.multi_reduction <add>, %144, %cst_53 [1] : vector<16x16xf32> to vector<16xf32>
    %146 = vector.shape_cast %145 : vector<16xf32> to vector<16x1xf32>
    %147 = tpu.reciprocal %146 {approx = true} : vector<16x1xf32> -> vector<16x1xf32>
    %148 = vector.broadcast %147 : vector<16x1xf32> to vector<16x16xf32>
    %149 = arith.mulf %144, %148 : vector<16x16xf32>
    %cst_54 = arith.constant dense<0.000000e+00> : vector<16x32xf32>
    %150 = tpu.matmul %149, %135, %cst_54 {dimension_numbers = #tpu.dot_dimension_numbers<[1], [0], [0], [1], [0, 0, 1, 1], [], []>} : vector<16x16xf32>, vector<16x32xf32>, vector<16x32xf32> -> vector<16x32xf32>
    %151 = vector.extract_strided_slice %24 {offsets = [32, 0], sizes = [32, 64], strides = [1, 1]} : vector<64x64xf32> to vector<32x64xf32>
    %cst_55 = arith.constant dense<0.000000e+00> : vector<16x64xf32>
    %152 = tpu.matmul %150, %151, %cst_55 {dimension_numbers = #tpu.dot_dimension_numbers<[1], [0], [0], [1], [0, 0, 1, 1], [], []>} : vector<16x32xf32>, vector<32x64xf32>, vector<16x64xf32> -> vector<16x64xf32>
    %153 = arith.addf %132, %152 : vector<16x64xf32>
    %cst_56 = arith.constant 0.000000e+00 : f32
    %154 = vector.broadcast %cst_56 : f32 to vector<16x64xf32>
    %155 = vector.extract_strided_slice %17 {offsets = [48, 0], sizes = [16, 32], strides = [1, 1]} : vector<64x64xf32> to vector<16x32xf32>
    %156 = vector.extract_strided_slice %20 {offsets = [48, 0], sizes = [16, 32], strides = [1, 1]} : vector<64x64xf32> to vector<16x32xf32>
    %157 = vector.extract_strided_slice %23 {offsets = [48, 0], sizes = [16, 32], strides = [1, 1]} : vector<64x64xf32> to vector<16x32xf32>
    %158 = tpu.transpose %156, [1, 0] : vector<16x32xf32> -> vector<32x16xf32>
    %cst_57 = arith.constant dense<0.000000e+00> : vector<16x16xf32>
    %159 = tpu.matmul %155, %158, %cst_57 {dimension_numbers = #tpu.dot_dimension_numbers<[1], [0], [0], [1], [0, 0, 1, 1], [], []>} : vector<16x32xf32>, vector<32x16xf32>, vector<16x16xf32> -> vector<16x16xf32>
    %cst_58 = arith.constant 0.176776692 : f32
    %160 = vector.broadcast %cst_58 : f32 to vector<16x16xf32>
    %161 = arith.mulf %159, %160 : vector<16x16xf32>
    %cst_59 = arith.constant dense<0xFF800000> : vector<16xf32>
    %162 = vector.multi_reduction <maximumf>, %161, %cst_59 [1] : vector<16x16xf32> to vector<16xf32>
    %163 = vector.shape_cast %162 : vector<16xf32> to vector<16x1xf32>
    %164 = vector.broadcast %163 : vector<16x1xf32> to vector<16x16xf32>
    %165 = arith.subf %161, %164 : vector<16x16xf32>
    %166 = math.exp %165 : vector<16x16xf32>
    %cst_60 = arith.constant dense<0.000000e+00> : vector<16xf32>
    %167 = vector.multi_reduction <add>, %166, %cst_60 [1] : vector<16x16xf32> to vector<16xf32>
    %168 = vector.shape_cast %167 : vector<16xf32> to vector<16x1xf32>
    %169 = tpu.reciprocal %168 {approx = true} : vector<16x1xf32> -> vector<16x1xf32>
    %170 = vector.broadcast %169 : vector<16x1xf32> to vector<16x16xf32>
    %171 = arith.mulf %166, %170 : vector<16x16xf32>
    %cst_61 = arith.constant dense<0.000000e+00> : vector<16x32xf32>
    %172 = tpu.matmul %171, %157, %cst_61 {dimension_numbers = #tpu.dot_dimension_numbers<[1], [0], [0], [1], [0, 0, 1, 1], [], []>} : vector<16x16xf32>, vector<16x32xf32>, vector<16x32xf32> -> vector<16x32xf32>
    %173 = vector.extract_strided_slice %24 {offsets = [0, 0], sizes = [32, 64], strides = [1, 1]} : vector<64x64xf32> to vector<32x64xf32>
    %cst_62 = arith.constant dense<0.000000e+00> : vector<16x64xf32>
    %174 = tpu.matmul %172, %173, %cst_62 {dimension_numbers = #tpu.dot_dimension_numbers<[1], [0], [0], [1], [0, 0, 1, 1], [], []>} : vector<16x32xf32>, vector<32x64xf32>, vector<16x64xf32> -> vector<16x64xf32>
    %175 = arith.addf %154, %174 : vector<16x64xf32>
    %176 = vector.extract_strided_slice %17 {offsets = [48, 32], sizes = [16, 32], strides = [1, 1]} : vector<64x64xf32> to vector<16x32xf32>
    %177 = vector.extract_strided_slice %20 {offsets = [48, 32], sizes = [16, 32], strides = [1, 1]} : vector<64x64xf32> to vector<16x32xf32>
    %178 = vector.extract_strided_slice %23 {offsets = [48, 32], sizes = [16, 32], strides = [1, 1]} : vector<64x64xf32> to vector<16x32xf32>
    %179 = tpu.transpose %177, [1, 0] : vector<16x32xf32> -> vector<32x16xf32>
    %cst_63 = arith.constant dense<0.000000e+00> : vector<16x16xf32>
    %180 = tpu.matmul %176, %179, %cst_63 {dimension_numbers = #tpu.dot_dimension_numbers<[1], [0], [0], [1], [0, 0, 1, 1], [], []>} : vector<16x32xf32>, vector<32x16xf32>, vector<16x16xf32> -> vector<16x16xf32>
    %cst_64 = arith.constant 0.176776692 : f32
    %181 = vector.broadcast %cst_64 : f32 to vector<16x16xf32>
    %182 = arith.mulf %180, %181 : vector<16x16xf32>
    %cst_65 = arith.constant dense<0xFF800000> : vector<16xf32>
    %183 = vector.multi_reduction <maximumf>, %182, %cst_65 [1] : vector<16x16xf32> to vector<16xf32>
    %184 = vector.shape_cast %183 : vector<16xf32> to vector<16x1xf32>
    %185 = vector.broadcast %184 : vector<16x1xf32> to vector<16x16xf32>
    %186 = arith.subf %182, %185 : vector<16x16xf32>
    %187 = math.exp %186 : vector<16x16xf32>
    %cst_66 = arith.constant dense<0.000000e+00> : vector<16xf32>
    %188 = vector.multi_reduction <add>, %187, %cst_66 [1] : vector<16x16xf32> to vector<16xf32>
    %189 = vector.shape_cast %188 : vector<16xf32> to vector<16x1xf32>
    %190 = tpu.reciprocal %189 {approx = true} : vector<16x1xf32> -> vector<16x1xf32>
    %191 = vector.broadcast %190 : vector<16x1xf32> to vector<16x16xf32>
    %192 = arith.mulf %187, %191 : vector<16x16xf32>
    %cst_67 = arith.constant dense<0.000000e+00> : vector<16x32xf32>
    %193 = tpu.matmul %192, %178, %cst_67 {dimension_numbers = #tpu.dot_dimension_numbers<[1], [0], [0], [1], [0, 0, 1, 1], [], []>} : vector<16x16xf32>, vector<16x32xf32>, vector<16x32xf32> -> vector<16x32xf32>
    %194 = vector.extract_strided_slice %24 {offsets = [32, 0], sizes = [32, 64], strides = [1, 1]} : vector<64x64xf32> to vector<32x64xf32>
    %cst_68 = arith.constant dense<0.000000e+00> : vector<16x64xf32>
    %195 = tpu.matmul %193, %194, %cst_68 {dimension_numbers = #tpu.dot_dimension_numbers<[1], [0], [0], [1], [0, 0, 1, 1], [], []>} : vector<16x32xf32>, vector<32x64xf32>, vector<16x64xf32> -> vector<16x64xf32>
    %196 = arith.addf %175, %195 : vector<16x64xf32>
    %197 = tpu.concatenate %67, %110, %153, %196 in 0 : vector<16x64xf32>, vector<16x64xf32>, vector<16x64xf32>, vector<16x64xf32> -> vector<64x64xf32>
    %198 = vector.broadcast %4 : vector<1x64xf32> to vector<64x64xf32>
    %199 = arith.addf %197, %198 : vector<64x64xf32>
    %200 = arith.addf %199, %12 : vector<64x64xf32>
    %cst_69 = arith.constant dense<0.000000e+00> : vector<64xf32>
    %201 = vector.multi_reduction <add>, %200, %cst_69 [1] : vector<64x64xf32> to vector<64xf32>
    %202 = vector.shape_cast %201 : vector<64xf32> to vector<64x1xf32>
    %cst_70 = arith.constant 6.400000e+01 : f32
    %203 = vector.broadcast %cst_70 : f32 to vector<64x1xf32>
    %204 = arith.divf %202, %203 : vector<64x1xf32>
    %205 = vector.broadcast %204 : vector<64x1xf32> to vector<64x64xf32>
    %206 = arith.subf %200, %205 : vector<64x64xf32>
    %207 = arith.mulf %206, %206 : vector<64x64xf32>
    %cst_71 = arith.constant dense<0.000000e+00> : vector<64xf32>
    %208 = vector.multi_reduction <add>, %207, %cst_71 [1] : vector<64x64xf32> to vector<64xf32>
    %209 = vector.shape_cast %208 : vector<64xf32> to vector<64x1xf32>
    %cst_72 = arith.constant 6.400000e+01 : f32
    %210 = vector.broadcast %cst_72 : f32 to vector<64x1xf32>
    %211 = arith.divf %209, %210 : vector<64x1xf32>
    %cst_73 = arith.constant 9.99999974E-6 : f32
    %212 = vector.broadcast %cst_73 : f32 to vector<64x1xf32>
    %213 = arith.addf %211, %212 : vector<64x1xf32>
    %214 = math.rsqrt %213 : vector<64x1xf32>
    %215 = vector.broadcast %214 : vector<64x1xf32> to vector<64x64xf32>
    %216 = arith.mulf %206, %215 : vector<64x64xf32>
    %217 = vector.broadcast %5 : vector<1x64xf32> to vector<64x64xf32>
    %218 = arith.mulf %216, %217 : vector<64x64xf32>
    %219 = vector.broadcast %6 : vector<1x64xf32> to vector<64x64xf32>
    %220 = arith.addf %218, %219 : vector<64x64xf32>
    %221 = vector.shape_cast %220 : vector<64x64xf32> to vector<4x16x64xf32>
    %c0_74 = arith.constant 0 : index
    %c0_75 = arith.constant 0 : index
    %c0_76 = arith.constant 0 : index
    %222 = vector.load %arg6[%c0_74, %c0_75, %c0_76] : memref<4x16x64xf32, #tpu.memory_space<vmem>>, vector<4x16x64xf32>
    tpu.vector_store %arg6[%c0_74, %c0_75, %c0_76], %221 {strides = array<i32>} : memref<4x16x64xf32, #tpu.memory_space<vmem>>, vector<4x16x64xf32>,
    return
  }
  func.func @transform_0(%arg0: i32) -> (i32, i32, i32) {
    %c0_i32 = arith.constant 0 : i32
    %c0_i32_0 = arith.constant 0 : i32
    %c0_i32_1 = arith.constant 0 : i32
    return %arg0, %c0_i32, %c0_i32_0 : i32, i32, i32
  }
  func.func @transform_1(%arg0: i32) -> (i32, i32) {
    %c0_i32 = arith.constant 0 : i32
    %c0_i32_0 = arith.constant 0 : i32
    %c0_i32_1 = arith.constant 0 : i32
    return %c0_i32, %c0_i32_0 : i32, i32
  }
  func.func @transform_2(%arg0: i32) -> (i32, i32) {
    %c0_i32 = arith.constant 0 : i32
    %c0_i32_0 = arith.constant 0 : i32
    %c0_i32_1 = arith.constant 0 : i32
    return %c0_i32, %c0_i32_0 : i32, i32
  }
  func.func @transform_3(%arg0: i32) -> (i32, i32) {
    %c0_i32 = arith.constant 0 : i32
    %c0_i32_0 = arith.constant 0 : i32
    %c0_i32_1 = arith.constant 0 : i32
    return %c0_i32, %c0_i32_0 : i32, i32
  }
  func.func @transform_4(%arg0: i32) -> (i32, i32) {
    %c0_i32 = arith.constant 0 : i32
    %c0_i32_0 = arith.constant 0 : i32
    %c0_i32_1 = arith.constant 0 : i32
    return %c0_i32, %c0_i32_0 : i32, i32
  }
  func.func @transform_5(%arg0: i32) -> (i32, i32, i32) {
    %c0_i32 = arith.constant 0 : i32
    %c0_i32_0 = arith.constant 0 : i32
    %c0_i32_1 = arith.constant 0 : i32
    return %arg0, %c0_i32, %c0_i32_0 : i32, i32, i32
  }
}

</mosaic_0001>

<bundles_post_ra>
// kernel: tpu_custom_call.1
= control target key start
LH: loop header
LB: loop body
LE: loop exit
PB: predicated region body
PF: predicated region fallthrough
CT: control target
= control target key end

     0   :  { %10 = vsyncpa [#allocation3], 0  ;;  %s5034_s0 = inlined_call_operand.hbm [shape: f32[8,16,64], index: 0, kind: input, shape index: {}]   ;;  %s5035_s1 = inlined_call_operand.hbm [shape: f32[64,64], index: 1, kind: input, shape index: {}]   ;;  %s5036_s2 = inlined_call_operand.hbm [shape: f32[64,192], index: 2, kind: input, shape index: {}]   ;;  %s5037_s3 = inlined_call_operand.hbm [shape: f32[64,64], index: 3, kind: input, shape index: {}]   ;;  %s5038_s4 = inlined_call_operand.vmem [shape: f32[8,64], index: 4, kind: input, shape index: {}]   ;;  %s5039_s5 = inlined_call_operand.hbm [shape: f32[8,16,64], index: 5, kind: output, shape index: {}]  }
   0x1   :  { %12 = vsyncpa [#allocation3 + $0x1], 0 }
   0x2   :  { %13 = vsyncpa [#allocation6], 0 }
   0x3   :  { %14 = vsyncpa [#allocation9], 0 }
   0x4   :  { %15 = vsyncpa [#allocation4], 0 }
   0x5   :  { %17 = vsyncpa [#allocation4 + $0x1], 0  ;;  %s4287_s18 = smov 0   ;;  %s4289_s19 = smov 0  }
   0x6   :  { %s4291_s20 = smov 0   ;;  %s4293_s21 = smov 0  }
   0x7 LB: > { %s4308_s22 = sadd.s32 4294967295, %s4240_s21   ;;  %s3172_s23 = sadd.s32 4294967294, %s4240_s21   ;;  %s4240_s21 = sphi %s4293_s21, %s5070_s21   ;;  %s4236_s20 = sphi %s4291_s20, %s5069_s20   ;;  %s4232_s19 = sphi %s4289_s19, %s5068_s19   ;;  %s4228_s18 = sphi %s4287_s18, %s5067_s18  }
   0x8   : > { %p43_p0 = scmp.ne.s32.totalorder %s4232_s19, %s4228_s18  ;;  %p5040_p1 = scmp.eq.s32.totalorder %s4308_s22, 0 }
   0x9   : > { %p157_p3 = scmp.eq.s32.totalorder %s3172_s23, 1  ;;  %p3173_p5 = scmp.ge.s32.totalorder %s4240_s21, 1 }
   0xa   : > { %p4317_p4 = por %p5040_p1, %p43_p0  ;;  %p164_p7 = scmp.lt.s32.totalorder %s4240_s21, 3 }
   0xb   : > { %p4322_p6 = por %p157_p3, %p43_p0  ;;  %s4242_s27 = smov [#allocation5]  }
   0xc   : > { %s5047_s24 = scalar_select %p4317_p4, 1, 0 }
   0xd   : > { %s5048_s25 = scalar_select %p4322_p6, 1, 0 }
   0xe   : > { %p4327_p8 = pnand %p3173_p5, %p164_p7  ;;  %s176_s28 = sshll.u32 %s4242_s27, 4  ;;  %s4331_s28 = int_to_ptr.vmem [resolvable:$true] %s176_s28 }
   0xf   : > { %s4243_s30 = smov [#allocation7]   ;;  %s4052_s9 = scalar_lea.hbm %s5035_s1, 1024 }
  0x10   : > { %s5049_s26 = scalar_select %p4327_p8, 1, 0 }
  0x11   : > { %p3841_p9 = pneg %p4327_p8  ;;  %s189_s6 = sshll.u32 %s4243_s30, 4  ;;  %s4342_s6 = int_to_ptr.vmem [resolvable:$true] %s189_s6 }
  0x12   : > { %p4053_p12 = scmp.ne.s32.totalorder %s5035_s1, %s4052_s9  ;;  %p4059_p5 = scmp.lt.u32.totalorder %s4052_s9, %s5035_s1 }
  0x13   : > { %p4338_p11 = pnand %p3841_p9, %p5040_p1 }
  0x15   : > { %p4352_p13 = pneg %p4338_p11 }
  0x17   : > { %p4055_p0 = pnand %p4352_p13, %p4053_p12 }
  0x19   : > { %p4056_p3 = pneg %p4055_p0 }
  0x1b   : > { %p4061_p7 = pnand %p4059_p5, %p4056_p3 }
  0x1d   : > { %4064 = shalt.err (!%p4061_p7)
}
  0x1e   : > { %s4065_s15 = scalar_lea.vmem %s4331_s28, 1024  ;;  %p4073_p2 = scmp.lt.s32.totalorder %s4331_s28, %s4331_s28 }
  0x1f   : > { %p4066_p9 = scmp.ne.s32.totalorder %s4331_s28, %s4065_s15  ;;  %p4074_p6 = scmp.lt.s32.totalorder %s4065_s15, %s4065_s15 }
  0x21   : > { %p4068_p10 = pnand %p4066_p9, %p4352_p13  ;;  %p4075_p12 = por %p4074_p6, %p4073_p2 }
  0x23   : > { %p4069_p1 = pneg %p4068_p10 }
  0x25   : > { %p4076_p0 = pnand %p4075_p12, %p4069_p1 }
  0x27   : > { %4079 = shalt.err (!%p4076_p0)
}
  0x28   : > { %s5041_s16 = smov 128   ;;  %s5043_s17 = smov 8  }
  0x29   : > { %3844 = dma.hbm_to_vmem [thread:$0]  (!%p4338_p11), %s5035_s1, 1024, %s4331_s28, [#allocation6], %s5041_s16, %s5041_s16, %s5043_s17  }
  0x2a   : > { %s4080_s8 = scalar_lea.hbm %s5036_s2, 2048 }
  0x2b   : > { %p4081_p1 = scmp.ne.s32.totalorder %s5036_s2, %s4080_s8  ;;  %p4087_p10 = scmp.lt.u32.totalorder %s4080_s8, %s5036_s2 }
  0x2d   : > { %p4083_p2 = pnand %p4081_p1, %p4352_p13 }
  0x2f   : > { %p4084_p6 = pneg %p4083_p2 }
  0x31   : > { %p4089_p3 = pnand %p4087_p10, %p4084_p6 }
  0x33   : > { %4092 = shalt.err (!%p4089_p3)
}
  0x34   : > { %s4093_s28 = scalar_lea.vmem %s4342_s6, 2048  ;;  %p4101_p12 = scmp.lt.s32.totalorder %s4342_s6, %s4342_s6 }
  0x35   : > { %p4094_p5 = scmp.ne.s32.totalorder %s4342_s6, %s4093_s28  ;;  %p4102_p0 = scmp.lt.s32.totalorder %s4093_s28, %s4093_s28 }
  0x37   : > { %p4096_p7 = pnand %p4094_p5, %p4352_p13  ;;  %p4103_p1 = por %p4102_p0, %p4101_p12 }
  0x39   : > { %p4097_p9 = pneg %p4096_p7 }
  0x3b   : > { %p4104_p2 = pnand %p4103_p1, %p4097_p9 }
  0x3d   : > { %4107 = shalt.err (!%p4104_p2)
}
  0x3e   : > { %s4246_s14 = smov 256   ;;  %s4247_s15 = smov 16  }
  0x3f   : > { %3847 = dma.hbm_to_vmem [thread:$0]  (!%p4338_p11), %s5036_s2, 2048, %s4342_s6, [#allocation6], %s4246_s14, %s4246_s14, %s4247_s15  }
  0x40   : > { %s4248_s30 = smov [#allocation8]   ;;  %s4400_s8 = sadd.s32 1, %s4240_s21  }
  0x41   : > { %s202_s7 = sshll.u32 %s4248_s30, 4  ;;  %s4108_s11 = scalar_lea.hbm %s5037_s3, 1024  ;;  %s203_s7 = int_to_ptr.vmem [resolvable:$true] %s202_s7 }
  0x42   : > { %p4109_p6 = scmp.ne.s32.totalorder %s5037_s3, %s4108_s11  ;;  %p4115_p5 = scmp.lt.u32.totalorder %s4108_s11, %s5037_s3 }
  0x44   : > { %p4111_p10 = pnand %p4109_p6, %p4352_p13 }
  0x46   : > { %p4112_p3 = pneg %p4111_p10 }
  0x48   : > { %p4117_p7 = pnand %p4115_p5, %p4112_p3 }
  0x4a   : > { %4120 = shalt.err (!%p4117_p7)
}
  0x4b   : > { %s4121_s6 = scalar_lea.vmem %s203_s7, 1024  ;;  %p4129_p1 = scmp.lt.s32.totalorder %s203_s7, %s203_s7 }
  0x4c   : > { %p4122_p9 = scmp.ne.s32.totalorder %s203_s7, %s4121_s6  ;;  %p4130_p2 = scmp.lt.s32.totalorder %s4121_s6, %s4121_s6 }
  0x4e   : > { %p4124_p12 = pnand %p4122_p9, %p4352_p13  ;;  %p4131_p4 = por %p4130_p2, %p4129_p1 }
  0x50   : > { %p4125_p0 = pneg %p4124_p12 }
  0x52   : > { %p4132_p8 = pnand %p4131_p4, %p4125_p0 }
  0x54   : > { %4135 = shalt.err (!%p4132_p8)
}
  0x55   : > { %s5052_s14 = smov 8   ;;  %s5053_s15 = smov 128  }
  0x56   : > { %3850 = dma.hbm_to_vmem [thread:$0]  (!%p4338_p11), %s5037_s3, 1024, %s203_s7, [#allocation9], %s5053_s15, %s5053_s15, %s5052_s14  }
  0x57   : > { %s27_s12 = ssub.s32 %s4240_s21, %s4400_s8  ;;  %s30_s29 = sadd.s32 1, %s4236_s20 }
  0x58   : > { %p28_p4 = scmp.eq.s32.totalorder %s27_s12, 0  ;;  %p37_p8 = scmp.ne.s32.totalorder %s4236_s20, %s4232_s19 }
  0x59   : > { %p38_p13 = scmp.eq.s32.totalorder %s4240_s21, 0  ;;  %p3862_p6 = scmp.lt.s32.totalorder %s4240_s21, 2 }
  0x5a   : > { %s4431_s23 = scalar_select %p28_p4, %s4236_s20, %s30_s29  }
  0x5b   : > { %p39_p10 = por %p38_p13, %p37_p8  ;;  %p5054_p3 = scmp.eq.s32.totalorder %s4308_s22, 1 }
  0x5c   : > { %s219_s30 = sand.u32 1, %s4236_s20   ;;  %s3282_s9 = sshll.u32 %s4240_s21, 10 }
  0x5d   : > { %p4435_p5 = por %p5054_p3, %p37_p8  ;;  %s3178_s10 = sshll.u32 %s219_s30, 6 }
  0x5e   : > { %s4444_s7 = scalar_lea.hbm %s5034_s0, %s3282_s9  ;;  %s223_s28 = scalar_lea.vmem [#allocation2], %s3178_s10 }
  0x5f   : > { %s231_s6 = sshll.u32 %s223_s28, 4  ;;  %p4446_p11 = pnand %p3862_p6, %p39_p10  ;;  %s4450_s6 = int_to_ptr.vmem [resolvable:$true] %s231_s6 }
  0x60   : > { %s4452_s17 = scalar_lea.sflag [#allocation3], %s219_s30  ;;  %s4136_s12 = scalar_lea.hbm %s4444_s7, 1024 }
  0x61   : > { %p4137_p7 = scmp.ne.s32.totalorder %s4444_s7, %s4136_s12  ;;  %p4138_p9 = pneg %p4446_p11 }
  0x62   : > { %s4141_s10 = scalar_lea.hbm %s5034_s0, 2048  ;;  %p4142_p1 = scmp.lt.u32.totalorder %s4444_s7, %s5034_s0 }
  0x63   : > { %p4139_p12 = pnand %p4138_p9, %p4137_p7  ;;  %p4143_p2 = scmp.lt.u32.totalorder %s4141_s10, %s4136_s12 }
  0x64   : > { %p4145_p8 = scmp.lt.u32.totalorder %s4136_s12, %s4444_s7 }
  0x65   : > { %p4140_p0 = pneg %p4139_p12  ;;  %p4144_p4 = por %p4143_p2, %p4142_p1 }
  0x67   : > { %p4146_p13 = por %p4145_p8, %p4144_p4 }
  0x69   : > { %p4147_p6 = pnand %p4146_p13, %p4140_p0 }
  0x6b   : > { %4150 = shalt.err (!%p4147_p6)
}
  0x6c   : > { %s4151_s30 = scalar_lea.vmem %s4450_s6, 1024  ;;  %s4249_s28 = smov [#allocation2]  }
  0x6d   : > { %p4152_p10 = scmp.ne.s32.totalorder %s4450_s6, %s4151_s30  ;;  %s4156_s29 = sshll.u32 %s4249_s28, 4  ;;  %s4157_s29 = int_to_ptr.vmem [resolvable:$false] %s4156_s29 }
  0x6e   : > { %s4158_s9 = scalar_lea.vmem %s4157_s29, 2048  ;;  %p4159_p12 = scmp.lt.s32.totalorder %s4450_s6, %s4157_s29 }
  0x6f   : > { %p4154_p3 = pnand %p4152_p10, %p4138_p9  ;;  %p4160_p1 = scmp.lt.s32.totalorder %s4158_s9, %s4151_s30 }
  0x71   : > { %p4155_p7 = pneg %p4154_p3  ;;  %p4161_p2 = por %p4160_p1, %p4159_p12 }
  0x73   : > { %p4162_p4 = pnand %p4161_p2, %p4155_p7 }
  0x75   : > { %4165 = shalt.err (!%p4162_p4)
}
  0x76   : > { %3854 = dma.hbm_to_vmem [thread:$0]  (!%p4446_p11), %s4444_s7, 1024, %s4450_s6, %s4452_s17, %s5053_s15, %s5053_s15, %s5052_s14  }
  0x77   : > { %p5057_p9 = scmp.ne.s32.totalorder %s5049_s26, 0 }
  0x78   : > { %s4486_s12 = sand.u32 (!%p5057_p9), 1, %s4232_s19   ;;  %p5058_p0 = scmp.ne.s32.totalorder (!%p5057_p9), %s5047_s24, 0 }
  0x79   : > { %243 = sbr.rel (%p5057_p9) target bundleno = 3889 (0xf31), region = 40  ;;  %s3183_s10 = sshll.u32 (!%p5057_p9), %s4486_s12, 6 }
  0x7a   : > { %s246_s11 = scalar_lea.sflag (!%p5057_p9), [#allocation3], %s4486_s12  ;;  %s4492_s16 = scalar_lea.vmem (!%p5057_p9), [#allocation2], %s3183_s10 }
  0x80   : > { %4211 = dma.done.wait (%p5058_p0), %s246_s11, 1024  }
  0x81   : > { %4213 = vsyncadd (%p5058_p0), %s246_s11, 4294966272  ;;  %p5059_p11 = scmp.eq.s32.totalorder %s4308_s22, 0 }
  0x83   : > { %4215 = dma.done.wait (%p5059_p11), [#allocation6], 3072   ;;  %p5060_p8 = pmov %p5059_p11 }
  0x85   : > { %4217 = vsyncadd (%p5060_p8), [#allocation6], 4294964224  ;;  %p5061_p13 = pmov %p5060_p8 }
  0x86   : > { %p5062_p6 = pmov %p5060_p8 }
  0x87   : > { %4219 = dma.done.wait (%p5061_p13), [#allocation9], 1024  }
  0x88   : > { %4221 = vsyncadd (%p5062_p6), [#allocation9], 4294966272  ;;  %v305_v0 = vld [vmem:[#allocation5] sm:$0xff]  ;;  %v306_v1 = vld [vmem:[#allocation5 + $0x8] sm:$0xff]  ;;  %vm317_vm0 = vcmask 523264   ;;  %v4250_v44 = vmov 0.0  }
  0x89   : > { %v307_v2 = vld [vmem:[#allocation5 + $0x10] sm:$0xff]  ;;  %v3641_v3 = vpack.c.bf16 %v306_v1, %v305_v0  ;;  %v308_v4 = vld [vmem:[#allocation5 + $0x18] sm:$0xff]  ;;  %v309_v6 = vld [vmem:[#allocation5 + $0x20] sm:$0xff]  ;;  %551 = vmatprep.mubr.f32.mxu1 %v4250_v44  ;;  %s4251_s14 = smov 64   ;;  %vm654_vm1 = vcmask 261120   ;;  %s4252_s28 = smov 32  }
  0x8a   : > { %v3645_v5 = vpack.c.bf16 %v308_v4, %v307_v2  ;;  %v310_v7 = vld [vmem:[#allocation5 + $0x28] sm:$0xff]  ;;  %v297_v8 = vld [vmem:[%s4492_s16] sm:$0xff]  ;;  %v311_v9 = vld [vmem:[#allocation5 + $0x30] sm:$0xff]  ;;  %s4253_s29 = smov 96   ;;  %vm742_vm3 = vcmask 130048   ;;  %s4961_s15 = scalar_lea.vmem [#allocation10], %s3183_s10 }
  0x8b   : > { %3642 = vmatprep.subr.bf16.mxu0 %v3641_v3  ;;  %3429 = vmatprep.mubr.msk.f32.mxu0 %vm317_vm0, %v297_v8  ;;  %v3649_v10 = vpack.c.bf16 %v310_v7, %v309_v6  ;;  %v312_v11 = vld [vmem:[#allocation5 + $0x38] sm:$0xff]  ;;  %v448_v12 = vld [vmem:[#allocation7 + $0x8] sm:$0xff]  ;;  %v447_v15 = vld [vmem:[#allocation7] sm:$0xff]  ;;  %s3284_s10 = sshll.u32 %s4308_s22, 10  ;;  %s3070_s7 = sshll.u32 %s4961_s15, 4  ;;  %s4986_s7 = int_to_ptr.vmem [resolvable:$true] %s3070_s7 }
  0x8c   : > { %3644 = vmatpush3.bf16.msra.mxu0 %v3641_v3  ;;  %v450_v13 = vld [vmem:[#allocation7 + $0x18] sm:$0xff]  ;;  %v449_v16 = vld [vmem:[#allocation7 + $0x10] sm:$0xff]  ;;  %v452_v17 = vld [vmem:[#allocation7 + $0x28] sm:$0xff]  ;;  %v3653_v25 = vpack.c.bf16 %v312_v11, %v311_v9  ;;  %s4984_s13 = scalar_lea.hbm %s5039_s5, %s3284_s10  ;;  %s3056_s22 = scalar_lea.sflag [#allocation4], %s4486_s12 }
  0x8d   : > { %3646 = vmatprep.subr.bf16.mxu0 %v3645_v5  ;;  %v3657_v14 = vpack.c.bf16 %v450_v13, %v448_v12  ;;  %v3659_v18 = vpack.c.bf16 %v449_v16, %v447_v15  ;;  %v454_v19 = vld [vmem:[#allocation7 + $0x38] sm:$0xff]  ;;  %v451_v20 = vld [vmem:[#allocation7 + $0x20] sm:$0xff]  ;;  %v453_v21 = vld [vmem:[#allocation7 + $0x30] sm:$0xff]  ;;  %s4166_s30 = scalar_lea.vmem %s4986_s7, 1024 }
  0x8e   : > { %v3661_v22 = vpack.c.bf16 %v454_v19, %v452_v17  ;;  %v456_v23 = vld [vmem:[#allocation7 + $0x48] sm:$0xff]  ;;  %v458_v24 = vld [vmem:[#allocation7 + $0x58] sm:$0xff]  ;;  %v3663_v26 = vpack.c.bf16 %v453_v21, %v451_v20  ;;  %v455_v28 = vld [vmem:[#allocation7 + $0x40] sm:$0xff]  ;;  %p4167_p10 = scmp.ne.s32.totalorder %s4986_s7, %s4166_s30 }
  0x8f   : > { %3658 = vmatprep.subr.bf16.mxu1 %v3657_v14  ;;  %v3665_v27 = vpack.c.bf16 %v458_v24, %v456_v23  ;;  %v457_v29 = vld [vmem:[#allocation7 + $0x50] sm:$0xff]  ;;  %v298_v31 = vld [vmem:[%s4492_s16 + $0x8] sm:$0xff]  ;;  %v300_v33 = vld [vmem:[%s4492_s16 + $0x18] sm:$0xff] }
  0x90   : > { %3648 = vmatpush3.bf16.msra.mxu0 %v3645_v5  ;;  %3660 = vmatpush1.bf16.msra.mxu1 %v3659_v18  ;;  %v3667_v30 = vpack.c.bf16 %v457_v29, %v455_v28  ;;  %v299_v32 = vld [vmem:[%s4492_s16 + $0x10] sm:$0xff]  ;;  %v301_v34 = vld [vmem:[%s4492_s16 + $0x20] sm:$0xff]  ;;  %v302_v35 = vld [vmem:[%s4492_s16 + $0x28] sm:$0xff]  ;;  %p4168_p3 = pnand %p4167_p10, %p4435_p5 }
  0x91   : > { %3650 = vmatprep.subr.bf16.mxu0 %v3649_v10  ;;  %3662 = vmatprep.subr.bf16.mxu1 %v3661_v22  ;;  %v303_v36 = vld [vmem:[%s4492_s16 + $0x30] sm:$0xff]  ;;  %v304_v37 = vld [vmem:[%s4492_s16 + $0x38] sm:$0xff]  ;;  %v460_v38 = vld [vmem:[#allocation7 + $0x68] sm:$0xff] }
  0x92   : > { %v462_v39 = vld [vmem:[#allocation7 + $0x78] sm:$0xff]  ;;  %v459_v41 = vld [vmem:[#allocation7 + $0x60] sm:$0xff]  ;;  %v461_v42 = vld [vmem:[#allocation7 + $0x70] sm:$0xff]  ;;  %p4169_p7 = pneg %p4168_p3 }
  0x93   : > { %v3669_v40 = vpack.c.bf16 %v462_v39, %v460_v38  ;;  %v3671_v43 = vpack.c.bf16 %v461_v42, %v459_v41  ;;  %v3206_v45 = vld [vmem:[%s5038_s4 + $0x2] ss:$0 sm:$0xff]  ;;  %v3188_v46 = vld [vmem:[%s5038_s4] ss:$0 sm:$0xff]  ;;  %v3205_v63 = vld [vmem:[%s5038_s4 + $0x1] ss:$0 sm:$0xff] }
  0x94   : > { %3652 = vmatpush3.bf16.msra.mxu0 %v3649_v10  ;;  %3664 = vmatpush1.bf16.msra.mxu1 %v3663_v26  ;;  %v3207_v4 = vld [vmem:[%s5038_s4 + $0x3] ss:$0 sm:$0xff]  ;;  %vm4632_vm2 = vmpackc.low %vm654_vm1, %vm654_vm1 }
  0x95   : > { %3654 = vmatprep.subr.bf16.mxu0 %v3653_v25  ;;  %3666 = vmatprep.subr.bf16.mxu1 %v3665_v27 }
  0x96   : > { %617 = vrot.lane.b32.xlu0 %v3206_v45, %s4251_s14 }
  0x98   : > { %3656 = vmatpush3.bf16.msra.mxu0 %v3653_v25  ;;  %3668 = vmatpush1.bf16.msra.mxu1 %v3667_v30 }
  0x99   : > { %3670 = vmatprep.subr.bf16.mxu1 %v3669_v40 }
  0x9b   : > { %3430 = vmatmul.mubr.msk.f32.vlgmr.msra.gmra.mrb[0].mxu0 %vm317_vm0, %v298_v31 }
  0x9c   : > { %3432 = vmatprep.mubr.msk.f32.mxu0 %vm317_vm0, %v299_v32  ;;  %3672 = vmatpush1.bf16.msra.mxu1 %v3671_v43 }
  0x9f   : > { %3433 = vmatmul.mubr.msk.f32.gmra.mrb[2].mxu0 %vm317_vm0, %v300_v33 }
  0xa0   : > { %3435 = vmatprep.mubr.msk.f32.mxu0 %vm317_vm0, %v301_v34 }
  0xa3   : > { %3436 = vmatmul.mubr.msk.f32.gmra.mrb[4].mxu0 %vm317_vm0, %v302_v35 }
  0xa4   : > { %3438 = vmatprep.mubr.msk.f32.mxu0 %vm317_vm0, %v303_v36 }
  0xa7   : > { %3439 = vmatmul.mubr.msk.f32.gmra.mrb[6].mxu0 %vm317_vm0, %v304_v37 }
 0x108   : > { %v618_v3 = vpop.permute.xlu0 %617 }
 0x16e   : > { %v3431_v47 = vpop.f32.mrb[0].mxu0 }
 0x16f   : > { %v408_v48 = vpop.f32.mrb[1].mxu0  ;;  %v4533_v52 = vadd.f32 %v3431_v47, %v3188_v46 }
 0x170   : > { %v4529_v49 = vadd.f32 %v3188_v46, %v408_v48 }
 0x172   : > { %3197 = vmatmul.mubr.msk.f32.vlgmr.msra.gmra.mrb[0].mxu1 %vm317_vm0, %v4529_v49  ;;  %v3434_v50 = vpop.f32.mrb[2].mxu0 }
 0x173   : > { %557 = vmatprep.mubr.f32.mxu1 %v4250_v44  ;;  %v418_v51 = vpop.f32.mrb[3].mxu0  ;;  %v4539_v56 = vadd.f32 %v3434_v50, %v3188_v46 }
 0x174   : > { %v4537_v53 = vadd.f32 %v3188_v46, %v418_v51 }
 0x176   : > { %3198 = vmatmul.mubr.msk.f32.gmra.mrb[2].mxu1 %vm317_vm0, %v4533_v52  ;;  %v3437_v54 = vpop.f32.mrb[4].mxu0 }
 0x177   : > { %563 = vmatprep.mubr.f32.mxu1 %v4250_v44  ;;  %v428_v55 = vpop.f32.mrb[5].mxu0  ;;  %v4547_v60 = vadd.f32 %v3437_v54, %v3188_v46 }
 0x178   : > { %v4545_v59 = vadd.f32 %v3188_v46, %v428_v55 }
 0x17a   : > { %3199 = vmatmul.mubr.msk.f32.gmra.mrb[4].mxu1 %vm317_vm0, %v4537_v53  ;;  %v3440_v57 = vpop.f32.mrb[6].mxu0 }
 0x17b   : > { %569 = vmatprep.mubr.f32.mxu1 %v4250_v44  ;;  %v438_v58 = vpop.f32.mrb[7].mxu0  ;;  %v4555_v62 = vadd.f32 %v3440_v57, %v3188_v46 }
 0x17c   : > { %v4553_v61 = vadd.f32 %v3188_v46, %v438_v58 }
 0x17e   : > { %3200 = vmatmul.mubr.msk.f32.gmra.mrb[6].mxu1 %vm317_vm0, %v4539_v56 }
 0x17f   : > { %575 = vmatprep.mubr.f32.mxu1 %v4250_v44 }
 0x182   : > { %3201 = vmatmul.mubr.msk.f32.gmra.mrb[8].mxu1 %vm317_vm0, %v4545_v59 }
 0x183   : > { %581 = vmatprep.mubr.f32.mxu1 %v4250_v44 }
 0x186   : > { %3202 = vmatmul.mubr.msk.f32.gmra.mrb[10].mxu1 %vm317_vm0, %v4547_v60 }
 0x187   : > { %587 = vmatprep.mubr.f32.mxu1 %v4250_v44 }
 0x18a   : > { %3203 = vmatmul.mubr.msk.f32.gmra.mrb[12].mxu1 %vm317_vm0, %v4553_v61 }
 0x18b   : > { %593 = vmatprep.mubr.f32.mxu1 %v4250_v44 }
 0x18e   : > { %3204 = vmatmul.mubr.msk.f32.gmra.mrb[14].mxu1 %vm317_vm0, %v4555_v62 }
 0x245   : > { %v553_v0 = vpop.f32.mrb[0].mxu1 }
 0x246   : > { %v604_v1 = vadd.f32 %v3205_v63, %v553_v0  ;;  %v555_v2 = vpop.f32.mrb[1].mxu1  ;;  %v620_v8 = vadd.f32 %v618_v3, %v553_v0 }
 0x247   : > { %v4568_v9 = vadd.f32 %v3207_v4, %v555_v2 }
 0x248   : > { %3445 = vmatprep.mubr.msk.f32.mxu0 %vm654_vm1, %v604_v1 }
 0x249   : > { %v559_v5 = vpop.f32.mrb[2].mxu1 }
 0x24a   : > { %v621_v6 = vadd.f32 %v618_v3, %v559_v5  ;;  %v561_v7 = vpop.f32.mrb[3].mxu1  ;;  %v605_v18 = vadd.f32 %v3205_v63, %v559_v5 }
 0x24b   : > { %v4570_v10 = vadd.f32 %v3207_v4, %v561_v7 }
 0x24c   : > { %v3917_v11 = vpack.i.bf16 %v621_v6, %v620_v8 }
 0x24d   : > { %v3922_v12 = vpack.i.bf16 %v4570_v10, %v4568_v9  ;;  %v4576_v13 = vpack.c.bf16 %v4570_v10, %v4568_v9  ;;  %v565_v14 = vpop.f32.mrb[4].mxu1 }
 0x24e   : > { %v4578_v15 = vadd.f32 %v3205_v63, %v565_v14  ;;  %3918 = vrot.lane.b32.xlu1 %v3917_v11, %s4252_s28  ;;  %3913 = vrot.lane.b32.xlu0 %v3917_v11, %s4251_s14  ;;  %v567_v16 = vpop.f32.mrb[5].mxu1  ;;  %v622_v20 = vadd.f32 %v618_v3, %v565_v14 }
 0x24f   : > { %v4582_v17 = vadd.f32 %v3207_v4, %v567_v16 }
 0x251   : > { %v571_v19 = vpop.f32.mrb[6].mxu1 }
 0x252   : > { %v623_v21 = vadd.f32 %v618_v3, %v571_v19  ;;  %v4584_v22 = vadd.f32 %v3205_v63, %v571_v19  ;;  %848 = vrot.lane.b32.xlu0 %v605_v18, %s4253_s29  ;;  %846 = vrot.lane.b32.xlu1 %v604_v1, %s4253_s29  ;;  %v573_v23 = vpop.f32.mrb[7].mxu1 }
 0x253   : > { %v4588_v24 = vadd.f32 %v3207_v4, %v573_v23 }
 0x254   : > { %v4590_v25 = vpack.i.bf16 %v623_v21, %v622_v20 }
 0x255   : > { %v3952_v26 = vpack.i.bf16 %v4588_v24, %v4582_v17  ;;  %v4596_v27 = vpack.c.bf16 %v4588_v24, %v4582_v17  ;;  %v577_v28 = vpop.f32.mrb[8].mxu1 }
 0x256   : > { %v4598_v29 = vadd.f32 %v3205_v63, %v577_v28  ;;  %v579_v30 = vpop.f32.mrb[9].mxu1  ;;  %v624_v33 = vadd.f32 %v618_v3, %v577_v28 }
 0x257   : > { %v4600_v31 = vadd.f32 %v3207_v4, %v579_v30 }
 0x259   : > { %v583_v32 = vpop.f32.mrb[10].mxu1 }
 0x25a   : > { %v625_v34 = vadd.f32 %v618_v3, %v583_v32  ;;  %v4602_v35 = vadd.f32 %v3205_v63, %v583_v32  ;;  %v585_v36 = vpop.f32.mrb[11].mxu1 }
 0x25b   : > { %v4604_v37 = vadd.f32 %v3207_v4, %v585_v36 }
 0x25c   : > { %v4606_v38 = vpack.i.bf16 %v625_v34, %v624_v33 }
 0x25d   : > { %v3962_v39 = vpack.i.bf16 %v4604_v37, %v4600_v31  ;;  %v4612_v40 = vpack.c.bf16 %v4604_v37, %v4600_v31  ;;  %v589_v41 = vpop.f32.mrb[12].mxu1 }
 0x25e   : > { %v4614_v42 = vadd.f32 %v3205_v63, %v589_v41  ;;  %v591_v43 = vpop.f32.mrb[13].mxu1  ;;  %v626_v46 = vadd.f32 %v618_v3, %v589_v41 }
 0x25f   : > { %v4616_v44 = vadd.f32 %v3207_v4, %v591_v43 }
 0x261   : > { %v595_v45 = vpop.f32.mrb[14].mxu1 }
 0x262   : > { %v627_v47 = vadd.f32 %v618_v3, %v595_v45  ;;  %v4618_v48 = vadd.f32 %v3205_v63, %v595_v45  ;;  %v597_v50 = vpop.f32.mrb[15].mxu1  ;;  %v4825_v63 = vld [vmem:[%s5038_s4 + $0x4] ss:$0 sm:$0xff] }
 0x263   : > { %v4620_v51 = vadd.f32 %v3207_v4, %v597_v50 }
 0x264   : > { %v4622_v54 = vpack.i.bf16 %v627_v47, %v626_v46 }
 0x265   : > { %v3967_v55 = vpack.i.bf16 %v4620_v51, %v4616_v44  ;;  %v4628_v57 = vpack.c.bf16 %v4620_v51, %v4616_v44 }
 0x2c0   : > { %v3919_v58 = vpop.permute.xlu1 %3918  ;;  %v3914_v0 = vpop.permute.xlu0 %3913 }
 0x2c1   : > { %v3921_v1 = vunpack.i.h.bf16 %v3919_v58  ;;  %v3920_v2 = vunpack.i.l.bf16 %v3919_v58  ;;  %v3916_v5 = vunpack.i.h.bf16 %v3914_v0  ;;  %v3915_v3 = vunpack.i.l.bf16 %v3914_v0 }
 0x2c3   : > { %v3683_v4 = vpack.c.bf16 %v3921_v1, %v3920_v2  ;;  %v3673_v6 = vpack.c.bf16 %v3916_v5, %v3915_v3 }
 0x2c4   : > { %v847_v7 = vpop.permute.xlu1 %846  ;;  %v849_v8 = vpop.permute.xlu0 %848 }
 0x2c5   : > { %3675 = vmatprep.subr.msk.bf16.mxu0 %vm4632_vm2, %v3673_v6  ;;  %3685 = vmatprep.subr.msk.bf16.mxu1 %vm4632_vm2, %v3683_v4 }
 0x2c6   : > { %3459 = vmatprep.mubr.msk.f32.mxu1 %vm654_vm1, %v847_v7  ;;  %3678 = vmatpush3.bf16.xpose.msk.msra.mxu0 %vm4632_vm2, %v3673_v6 }
 0x2c7   : > { %3688 = vmatpush3.bf16.xpose.msk.msra.mxu1 %vm4632_vm2, %v3683_v4  ;;  %3680 = vmatprep.subr.bf16.mxu0 %v4576_v13 }
 0x2cd   : > { %3446 = vmatmul.mubr.msk.f32.vlgmr.msra.gmra.mrb[8].mxu0 %vm654_vm1, %v605_v18 }
 0x2ce   : > { %3460 = vmatmul.mubr.msk.f32.vlgmr.msra.gmra.mrb[16].mxu1 %vm654_vm1, %v849_v8  ;;  %3682 = vmatpush3.bf16.msra.mxu0 %v4576_v13 }
 0x3a0   : > { %v3447_v11 = vpop.f32.mrb[8].mxu0 }
 0x3a1   : > { %v741_v14 = vmul.f32 0.17677669, %v3447_v11  ;;  %v3461_v16 = vpop.f32.mrb[16].mxu1  ;;  %v731_v19 = vpop.f32.mrb[9].mxu0 }
 0x3a2   : > { %v740_v20 = vmul.f32 0.17677669, %v731_v19  ;;  %v928_v21 = vpop.f32.mrb[17].mxu1  ;;  %v938_v30 = vmul.f32 0.17677669, %v3461_v16  ;;  %v645_v16 = vld [vmem:[#allocation8 + $0x28] sm:$0xff] }
 0x3a3   : > { %v937_v23 = vmul.f32 0.17677669, %v928_v21  ;;  %v746_v28 = vsel %vm742_vm3, %v741_v14, -inf }
 0x3a4   : > { %747 = vmax.xlane.f32.xlu0 %v746_v28  ;;  %v743_v32 = vsel %vm742_vm3, %v740_v20, -inf  ;;  %v942_v13 = vsel %vm742_vm3, %v938_v30, -inf }
 0x3a5   : > { %744 = vmax.xlane.f32.xlu1 %v743_v32  ;;  %v939_v18 = vsel %vm742_vm3, %v937_v23, -inf }
 0x3a8   : > { %940 = vmax.xlane.f32.xlu0 %v939_v18 }
 0x3a9   : > { %943 = vmax.xlane.f32.xlu1 %v942_v13 }
 0x431   : > { %v748_v33 = vpop.xlane.xlu0 %747 }
 0x432   : > { %v750_v34 = vsub.f32 %v741_v14, %v748_v33  ;;  %v745_v36 = vpop.xlane.xlu1 %744  ;;  %v644_v14 = vld [vmem:[#allocation8 + $0x20] sm:$0xff] }
 0x433   : > { %v749_v41 = vsub.f32 %v740_v20, %v745_v36  ;;  %v4669_v19 = vpack.c.bf16 %v645_v16, %v644_v14 }
 0x434   : > { %v753_v43 = vmul.f32 1.442695, %v750_v34 }
 0x435   : > { %v751_v45 = vmul.f32 1.442695, %v749_v41  ;;  %v941_v46 = vpop.xlane.xlu0 %940  ;;  %3694 = vmatprep.subr.bf16.mxu1 %v4669_v19 }
 0x436   : > { %3972 = vpow2.f32 %v753_v43  ;;  %v945_v47 = vsub.f32 %v937_v23, %v941_v46  ;;  %v944_v50 = vpop.xlane.xlu1 %943  ;;  %3696 = vmatpush3.bf16.msra.mxu1 %v4669_v19  ;;  %v647_v46 = vld [vmem:[#allocation8 + $0x38] sm:$0xff] }
 0x437   : > { %3974 = vpow2.f32 %v751_v45  ;;  %v946_v58 = vsub.f32 %v938_v30, %v944_v50  ;;  %v646_v45 = vld [vmem:[#allocation8 + $0x30] sm:$0xff]  ;;  %v640_v50 = vld [vmem:[#allocation8] sm:$0xff] }
 0x438   : > { %v947_v0 = vmul.f32 1.442695, %v945_v47  ;;  %v4679_v47 = vpack.c.bf16 %v647_v46, %v646_v45 }
 0x439   : > { %v949_v1 = vmul.f32 1.442695, %v946_v58  ;;  %v641_v58 = vld [vmem:[#allocation8 + $0x8] sm:$0xff] }
 0x43a   : > { %3976 = vpow2.f32 %v947_v0  ;;  %3698 = vmatprep.subr.bf16.mxu1 %v4679_v47  ;;  %v4683_v0 = vpack.c.bf16 %v641_v58, %v640_v50 }
 0x43b   : > { %3978 = vpow2.f32 %v949_v1  ;;  %3700 = vmatpush3.bf16.msra.mxu1 %v4679_v47 }
 0x43c   : > { %3702 = vmatprep.subr.bf16.mxu1 %v4683_v0 }
 0x440   : > { %v3973_v2 = vpop.eup %3972 }
 0x441   : > { %v3975_v5 = vpop.eup %3974  ;;  %v758_v3 = vsel %vm742_vm3, %v3973_v2, 0.0 }
 0x442   : > { %759 = vadd.xlane.f32.xlu1 %v758_v3  ;;  %v755_v4 = vsel %vm742_vm3, %v3975_v5, 0.0  ;;  %v643_v3 = vld [vmem:[#allocation8 + $0x18] sm:$0xff] }
 0x443   : > { %756 = vadd.xlane.f32.xlu0 %v755_v4 }
 0x444   : > { %v3977_v6 = vpop.eup %3976 }
 0x445   : > { %v3979_v7 = vpop.eup %3978  ;;  %v951_v8 = vsel %vm742_vm3, %v3977_v6, 0.0 }
 0x446   : > { %v954_v11 = vsel %vm742_vm3, %v3979_v7, 0.0 }
 0x447   : > { %952 = vadd.xlane.f32.xlu0 %v951_v8  ;;  %955 = vadd.xlane.f32.xlu1 %v954_v11 }
 0x458   : > { %3928 = vrot.lane.b32.xlu1 %v4590_v25, %s4252_s28 }
 0x45c   : > { %3933 = vrot.lane.b32.xlu1 %v4606_v38, %s4251_s14 }
 0x45d   : > { %3923 = vrot.lane.b32.xlu0 %v3922_v12, %s4253_s29 }
 0x460   : > { %1410 = vrot.lane.b32.xlu1 %v4584_v22, %s4253_s29 }
 0x461   : > { %1408 = vrot.lane.b32.xlu0 %v4578_v15, %s4253_s29 }
 0x4cf   : > { %v760_v20 = vpop.xlane.xlu1 %759 }
 0x4d0   : > { %3980 = vrcp.f32 %v760_v20  ;;  %v757_v21 = vpop.xlane.xlu0 %756 }
 0x4d1   : > { %3982 = vrcp.f32 %v757_v21 }
 0x4d4   : > { %v953_v9 = vpop.xlane.xlu0 %952  ;;  %v956_v10 = vpop.xlane.xlu1 %955 }
 0x4d5   : > { %3984 = vrcp.f32 %v953_v9 }
 0x4d6   : > { %3986 = vrcp.f32 %v956_v10 }
 0x4d8   : > { %v3924_v12 = vpop.permute.xlu0 %3923  ;;  %v3929_v4 = vpop.permute.xlu1 %3928 }
 0x4d9   : > { %v3926_v23 = vunpack.i.h.bf16 %v3924_v12  ;;  %v3925_v28 = vunpack.i.l.bf16 %v3924_v12  ;;  %v3931_v8 = vunpack.i.h.bf16 %v3929_v4  ;;  %v3930_v11 = vunpack.i.l.bf16 %v3929_v4 }
 0x4da   : > { %v3981_v30 = vpop.eup %3980 }
 0x4db   : > { %v3983_v32 = vpop.eup %3982  ;;  %v3689_v18 = vpack.c.bf16 %v3926_v23, %v3925_v28  ;;  %v764_v33 = vmul.f32 %v3981_v30, %v3973_v2  ;;  %v3719_v14 = vpack.c.bf16 %v3931_v8, %v3930_v11 }
 0x4dc   : > { %v763_v13 = vmul.f32 %v3983_v32, %v3975_v5  ;;  %v642_v5 = vld [vmem:[#allocation8 + $0x10] sm:$0xff]  ;;  %v3934_v16 = vpop.permute.xlu1 %3933  ;;  %v1409_v20 = vpop.permute.xlu0 %1408 }
 0x4dd   : > { %3690 = vmatprep.subr.bf16.mxu0 %v3689_v18  ;;  %v3936_v21 = vunpack.i.h.bf16 %v3934_v16  ;;  %v3935_v9 = vunpack.i.l.bf16 %v3934_v16 }
 0x4de   : > { %3452 = vmatprep.mubr.msk.f32.mxu0 %vm742_vm3, %v763_v13 }
 0x4df   : > { %v3985_v34 = vpop.eup %3984  ;;  %3453 = vmatmul.mubr.msk.f32.vlgmr.msra.gmra.mrb[10].mxu0 %vm742_vm3, %v764_v33  ;;  %v3745_v10 = vpack.c.bf16 %v3936_v21, %v3935_v9 }
 0x4e0   : > { %v3987_v36 = vpop.eup %3986  ;;  %3692 = vmatpush3.bf16.msra.mxu0 %v3689_v18  ;;  %v959_v41 = vmul.f32 %v3985_v34, %v3977_v6  ;;  %v1411_v12 = vpop.permute.xlu1 %1410 }
 0x4e1   : > { %v960_v43 = vmul.f32 %v3987_v36, %v3979_v7  ;;  %v4686_v7 = vpack.c.bf16 %v643_v3, %v642_v5 }
 0x4e2   : > { %3466 = vmatprep.mubr.msk.f32.mxu0 %vm742_vm3, %v959_v41 }
 0x4e3   : > { %3467 = vmatmul.mubr.msk.f32.vlgmr.msra.gmra.mrb[12].mxu0 %vm742_vm3, %v960_v43 }
 0x4e4   : > { %3495 = vmatprep.mubr.msk.f32.mxu0 %vm654_vm1, %v4578_v15 }
 0x5b2   : > { %v3454_v1 = vpop.f32.mrb[10].mxu0 }
 0x5b3   : > { %v837_v2 = vpop.f32.mrb[11].mxu0 }
 0x5b6   : > { %v3468_v15 = vpop.f32.mrb[12].mxu0 }
 0x5b7   : > { %v1041_v6 = vpop.f32.mrb[13].mxu0 }
 0x5b8   : > { %3477 = vmatprep.mubr.msk.f32.mxu1 %vm654_vm1, %v1041_v6 }
 0x5b9   : > { %3478 = vmatmul.mubr.msk.f32.vlgmr.msra.gmra.mrb[18].mxu1 %vm654_vm1, %v3468_v15 }
 0x5ba   : > { %3704 = vmatpush3.bf16.msra.mxu1 %v4683_v0  ;;  %3488 = vmatprep.mubr.msk.f32.mxu1 %vm654_vm1, %v837_v2 }
 0x5bb   : > { %3706 = vmatprep.subr.bf16.mxu1 %v4686_v7 }
 0x5be   : > { %3708 = vmatpush3.bf16.msra.mxu1 %v4686_v7 }
 0x5bf   : > { %3721 = vmatprep.subr.msk.bf16.mxu1 %vm4632_vm2, %v3719_v14 }
 0x5c1   : > { %3489 = vmatmul.mubr.msk.f32.vlgmr.msra.gmra.mrb[18].mxu1 %vm654_vm1, %v3454_v1 }
 0x5c2   : > { %3509 = vmatprep.mubr.msk.f32.mxu1 %vm654_vm1, %v1409_v20 }
 0x5c7   : > { %3724 = vmatpush3.bf16.xpose.msk.msra.mxu1 %vm4632_vm2, %v3719_v14 }
 0x5c8   : > { %3747 = vmatprep.subr.msk.bf16.mxu1 %vm4632_vm2, %v3745_v10 }
 0x5ce   : > { %3510 = vmatmul.mubr.msk.f32.vlgmr.msra.gmra.mrb[20].mxu1 %vm654_vm1, %v1411_v12 }
 0x5cf   : > { %3750 = vmatpush3.bf16.xpose.msk.msra.mxu1 %vm4632_vm2, %v3745_v10  ;;  %3545 = vmatprep.mubr.msk.f32.mxu1 %vm654_vm1, %v4598_v29 }
 0x5d0   : > { %3752 = vmatprep.subr.bf16.mxu1 %v4612_v40 }
 0x5d6   : > { %3546 = vmatmul.mubr.msk.f32.vlgmr.msra.gmra.mrb[22].mxu1 %vm654_vm1, %v4602_v35 }
 0x5d7   : > { %3754 = vmatpush3.bf16.msra.mxu1 %v4612_v40 }
 0x694   : > { %v4711_v23 = vpop.f32.mrb[18].mxu1 }
 0x695   : > { %v4713_v28 = vpop.f32.mrb[19].mxu1  ;;  %v2903_v44 = vadd.f32 %v4711_v23, %v4825_v63 }
 0x697   : > { %v2911_v51 = vadd.f32 %v2903_v44, %v4533_v52 }
 0x6a1   : > { %v4715_v30 = vpop.f32.mrb[20].mxu1 }
 0x6a2   : > { %v4717_v32 = vpop.f32.mrb[21].mxu1 }
 0x6a9   : > { %v3547_v18 = vpop.f32.mrb[22].mxu1 }
 0x6aa   : > { %v1866_v13 = vmul.f32 0.17677669, %v3547_v18  ;;  %v1856_v33 = vpop.f32.mrb[23].mxu1 }
 0x6ab   : > { %v1865_v34 = vmul.f32 0.17677669, %v1856_v33 }
 0x6ac   : > { %v1870_v36 = vsel %vm742_vm3, %v1866_v13, -inf }
 0x6ad   : > { %1871 = vmax.xlane.f32.xlu1 %v1870_v36  ;;  %v1867_v41 = vsel %vm742_vm3, %v1865_v34, -inf }
 0x6ae   : > { %1868 = vmax.xlane.f32.xlu0 %v1867_v41 }
 0x6c4   : > { %3938 = vrot.lane.b32.xlu0 %v4590_v25, %s4251_s14 }
 0x6c8   : > { %3948 = vrot.lane.b32.xlu0 %v4622_v54, %s4251_s14 }
 0x6cc   : > { %1970 = vrot.lane.b32.xlu0 %v4598_v29, %s4253_s29 }
 0x6d0   : > { %1972 = vrot.lane.b32.xlu0 %v4602_v35, %s4253_s29 }
 0x73a   : > { %v1872_v40 = vpop.xlane.xlu1 %1871 }
 0x73b   : > { %v1874_v43 = vsub.f32 %v1866_v13, %v1872_v40  ;;  %v1869_v45 = vpop.xlane.xlu0 %1868  ;;  %v1499_v40 = vmul.f32 0.17677669, %v4717_v32 }
 0x73c   : > { %v1873_v46 = vsub.f32 %v1865_v34, %v1869_v45  ;;  %v1500_v45 = vmul.f32 0.17677669, %v4715_v30 }
 0x73d   : > { %v1877_v50 = vmul.f32 1.442695, %v1874_v43 }
 0x73e   : > { %v1875_v58 = vmul.f32 1.442695, %v1873_v46 }
 0x73f   : > { %3988 = vpow2.f32 %v1877_v50  ;;  %v3939_v1 = vpop.permute.xlu0 %3938  ;;  %v1501_v50 = vsel %vm742_vm3, %v1499_v40, -inf }
 0x740   : > { %v3941_v2 = vunpack.i.h.bf16 %v3939_v1  ;;  %v3940_v5 = vunpack.i.l.bf16 %v3939_v1  ;;  %3990 = vpow2.f32 %v1875_v58  ;;  %v1504_v58 = vsel %vm742_vm3, %v1500_v45, -inf }
 0x742   : > { %v3709_v25 = vpack.c.bf16 %v3941_v2, %v3940_v5 }
 0x743   : > { %v3949_v20 = vpop.permute.xlu0 %3948 }
 0x744   : > { %3711 = vmatprep.subr.msk.bf16.mxu0 %vm4632_vm2, %v3709_v25  ;;  %v3951_v21 = vunpack.i.h.bf16 %v3949_v20  ;;  %v3950_v9 = vunpack.i.l.bf16 %v3949_v20 }
 0x745   : > { %3714 = vmatpush3.bf16.xpose.msk.msra.mxu0 %vm4632_vm2, %v3709_v25 }
 0x746   : > { %3716 = vmatprep.subr.bf16.mxu0 %v4596_v27 }
 0x747   : > { %v1971_v18 = vpop.permute.xlu0 %1970 }
 0x749   : > { %v3989_v29 = vpop.eup %3988 }
 0x74a   : > { %v1882_v35 = vsel %vm742_vm3, %v3989_v29, 0.0  ;;  %v3991_v3 = vpop.eup %3990 }
 0x74b   : > { %1883 = vadd.xlane.f32.xlu1 %v1882_v35  ;;  %v1879_v4 = vsel %vm742_vm3, %v3991_v3, 0.0  ;;  %v1973_v13 = vpop.permute.xlu0 %1972 }
 0x74c   : > { %3496 = vmatmul.mubr.msk.f32.vlgmr.msra.gmra.mrb[14].mxu0 %vm654_vm1, %v4584_v22 }
 0x74d   : > { %3718 = vmatpush3.bf16.msra.mxu0 %v4596_v27 }
 0x74f   : > { %1880 = vadd.xlane.f32.xlu1 %v1879_v4 }
 0x760   : > { %3943 = vrot.lane.b32.xlu1 %v4606_v38, %s4252_s28  ;;  %v3781_v38 = vpack.c.bf16 %v3951_v21, %v3950_v9 }
 0x7d8   : > { %v1884_v15 = vpop.xlane.xlu1 %1883 }
 0x7d9   : > { %3992 = vrcp.f32 %v1884_v15 }
 0x7dc   : > { %v1881_v6 = vpop.xlane.xlu1 %1880 }
 0x7dd   : > { %3994 = vrcp.f32 %v1881_v6 }
 0x7e0   : > { %v3944_v8 = vpop.permute.xlu1 %3943 }
 0x7e1   : > { %v3946_v11 = vunpack.i.h.bf16 %v3944_v8  ;;  %v3945_v14 = vunpack.i.l.bf16 %v3944_v8 }
 0x7e3   : > { %v3755_v16 = vpack.c.bf16 %v3946_v11, %v3945_v14  ;;  %v3993_v22 = vpop.eup %3992 }
 0x7e4   : > { %v1888_v12 = vmul.f32 %v3993_v22, %v3989_v29 }
 0x7e5   : > { %3757 = vmatprep.subr.msk.bf16.mxu1 %vm4632_vm2, %v3755_v16 }
 0x7e7   : > { %v3995_v27 = vpop.eup %3994 }
 0x7e8   : > { %v1887_v10 = vmul.f32 %v3995_v27, %v3991_v3 }
 0x7ea   : > { %3552 = vmatprep.mubr.msk.f32.mxu1 %vm742_vm3, %v1887_v10 }
 0x7eb   : > { %3553 = vmatmul.mubr.msk.f32.vlgmr.msra.gmra.mrb[24].mxu1 %vm742_vm3, %v1888_v12 }
 0x7ec   : > { %3760 = vmatpush3.bf16.xpose.msk.msra.mxu1 %vm4632_vm2, %v3755_v16  ;;  %3559 = vmatprep.mubr.msk.f32.mxu1 %vm654_vm1, %v1971_v18 }
 0x7ed   : > { %3783 = vmatprep.subr.msk.bf16.mxu1 %vm4632_vm2, %v3781_v38 }
 0x7f3   : > { %3560 = vmatmul.mubr.msk.f32.vlgmr.msra.gmra.mrb[26].mxu1 %vm654_vm1, %v1973_v13 }
 0x7f4   : > { %3786 = vmatpush3.bf16.xpose.msk.msra.mxu1 %vm4632_vm2, %v3781_v38  ;;  %3595 = vmatprep.mubr.msk.f32.mxu1 %vm654_vm1, %v4614_v42 }
 0x7f5   : > { %3788 = vmatprep.subr.bf16.mxu1 %v4628_v57 }
 0x7fb   : > { %3596 = vmatmul.mubr.msk.f32.vlgmr.msra.gmra.mrb[28].mxu1 %vm654_vm1, %v4618_v48 }
 0x7fc   : > { %3790 = vmatpush3.bf16.msra.mxu1 %v4628_v57 }
 0x81f   : > { %v3497_v33 = vpop.f32.mrb[14].mxu0 }
 0x820   : > { %v1304_v34 = vmul.f32 0.17677669, %v3497_v33  ;;  %v1294_v36 = vpop.f32.mrb[15].mxu0 }
 0x821   : > { %v1303_v41 = vmul.f32 0.17677669, %v1294_v36 }
 0x822   : > { %v1308_v43 = vsel %vm742_vm3, %v1304_v34, -inf }
 0x823   : > { %1309 = vmax.xlane.f32.xlu0 %v1308_v43  ;;  %v1305_v46 = vsel %vm742_vm3, %v1303_v41, -inf }
 0x824   : > { %1306 = vmax.xlane.f32.xlu1 %v1305_v46 }
 0x827   : > { %1502 = vmax.xlane.f32.xlu0 %v1501_v50 }
 0x828   : > { %1505 = vmax.xlane.f32.xlu1 %v1504_v58 }
 0x8b0   : > { %v1310_v1 = vpop.xlane.xlu0 %1309 }
 0x8b1   : > { %v1307_v57 = vpop.xlane.xlu1 %1306  ;;  %v1312_v32 = vsub.f32 %v1304_v34, %v1310_v1 }
 0x8b2   : > { %v1311_v25 = vsub.f32 %v1303_v41, %v1307_v57 }
 0x8b3   : > { %v1315_v35 = vmul.f32 1.442695, %v1312_v32 }
 0x8b4   : > { %v1503_v30 = vpop.xlane.xlu0 %1502  ;;  %v1313_v4 = vmul.f32 1.442695, %v1311_v25 }
 0x8b5   : > { %v1506_v29 = vpop.xlane.xlu1 %1505  ;;  %v1507_v15 = vsub.f32 %v1499_v40, %v1503_v30  ;;  %3996 = vpow2.f32 %v1315_v35 }
 0x8b6   : > { %v1508_v3 = vsub.f32 %v1500_v45, %v1506_v29  ;;  %3998 = vpow2.f32 %v1313_v4 }
 0x8b7   : > { %v1509_v14 = vmul.f32 1.442695, %v1507_v15 }
 0x8b8   : > { %v1511_v11 = vmul.f32 1.442695, %v1508_v3 }
 0x8ba   : > { %4000 = vpow2.f32 %v1511_v11 }
 0x8bb   : > { %4002 = vpow2.f32 %v1509_v14 }
 0x8be   : > { %v4765_v2 = vpop.f32.mrb[24].mxu1 }
 0x8bf   : > { %v4767_v5 = vpop.f32.mrb[25].mxu1  ;;  %v3997_v9 = vpop.eup %3996 }
 0x8c0   : > { %v3999_v12 = vpop.eup %3998  ;;  %v1320_v38 = vsel %vm742_vm3, %v3997_v9, 0.0 }
 0x8c1   : > { %v1317_v13 = vsel %vm742_vm3, %v3999_v12, 0.0 }
 0x8c4   : > { %v4001_v18 = vpop.eup %4000 }
 0x8c5   : > { %v4003_v33 = vpop.eup %4002  ;;  %v1516_v34 = vsel %vm742_vm3, %v4001_v18, 0.0 }
 0x8c6   : > { %v3561_v6 = vpop.f32.mrb[26].mxu1  ;;  %v1513_v36 = vsel %vm742_vm3, %v4003_v33, 0.0 }
 0x8c7   : > { %v4769_v8 = vpop.f32.mrb[27].mxu1  ;;  %v2062_v41 = vmul.f32 0.17677669, %v3561_v6 }
 0x8c9   : > { %v2066_v40 = vsel %vm742_vm3, %v2062_v41, -inf }
 0x8ce   : > { %v3597_v16 = vpop.f32.mrb[28].mxu1 }
 0x8cf   : > { %v2428_v20 = vmul.f32 0.17677669, %v3597_v16  ;;  %v2418_v22 = vpop.f32.mrb[29].mxu1 }
 0x8d0   : > { %v2427_v27 = vmul.f32 0.17677669, %v2418_v22 }
 0x8d1   : > { %v2432_v21 = vsel %vm742_vm3, %v2428_v20, -inf }
 0x8d2   : > { %2433 = vmax.xlane.f32.xlu1 %v2432_v21  ;;  %v2429_v10 = vsel %vm742_vm3, %v2427_v27, -inf }
 0x8d3   : > { %2430 = vmax.xlane.f32.xlu0 %v2429_v10 }
 0x8d6   : > { %1321 = vadd.xlane.f32.xlu1 %v1320_v38 }
 0x8d7   : > { %1318 = vadd.xlane.f32.xlu0 %v1317_v13 }
 0x8da   : > { %1517 = vadd.xlane.f32.xlu1 %v1516_v34 }
 0x8db   : > { %1514 = vadd.xlane.f32.xlu0 %v1513_v36 }
 0x8f1   : > { %3953 = vrot.lane.b32.xlu0 %v3952_v26, %s4253_s29 }
 0x8f5   : > { %2532 = vrot.lane.b32.xlu0 %v4614_v42, %s4253_s29 }
 0x8f9   : > { %2534 = vrot.lane.b32.xlu0 %v4618_v48, %s4253_s29 }
 0x918   : > { %2067 = vmax.xlane.f32.xlu0 %v2066_v40 }
 0x95f   : > { %v2434_v43 = vpop.xlane.xlu1 %2433 }
 0x960   : > { %v2436_v45 = vsub.f32 %v2428_v20, %v2434_v43  ;;  %v2431_v46 = vpop.xlane.xlu0 %2430 }
 0x961   : > { %v2435_v50 = vsub.f32 %v2427_v27, %v2431_v46 }
 0x962   : > { %v2439_v58 = vmul.f32 1.442695, %v2436_v45 }
 0x963   : > { %v2437_v57 = vmul.f32 1.442695, %v2435_v50  ;;  %v1322_v1 = vpop.xlane.xlu1 %1321 }
 0x964   : > { %4004 = vpow2.f32 %v2439_v58  ;;  %v1319_v17 = vpop.xlane.xlu0 %1318 }
 0x965   : > { %4006 = vpow2.f32 %v2437_v57 }
 0x966   : > { %4008 = vrcp.f32 %v1322_v1 }
 0x967   : > { %4010 = vrcp.f32 %v1319_v17  ;;  %v1518_v24 = vpop.xlane.xlu1 %1517 }
 0x968   : > { %v1515_v26 = vpop.xlane.xlu0 %1514 }
 0x969   : > { %4012 = vrcp.f32 %v1515_v26 }
 0x96a   : > { %4014 = vrcp.f32 %v1518_v24 }
 0x96c   : > { %v3954_v42 = vpop.permute.xlu0 %3953 }
 0x96d   : > { %v3956_v48 = vunpack.i.h.bf16 %v3954_v42  ;;  %v3955_v32 = vunpack.i.l.bf16 %v3954_v42 }
 0x96e   : > { %v4005_v25 = vpop.eup %4004 }
 0x96f   : > { %v4007_v29 = vpop.eup %4006  ;;  %v3725_v30 = vpack.c.bf16 %v3956_v48, %v3955_v32  ;;  %v2444_v35 = vsel %vm742_vm3, %v4005_v25, 0.0 }
 0x970   : > { %v4009_v3 = vpop.eup %4008  ;;  %2445 = vadd.xlane.f32.xlu1 %v2444_v35  ;;  %v2441_v14 = vsel %vm742_vm3, %v4007_v29, 0.0  ;;  %v2533_v27 = vpop.permute.xlu0 %2532 }
 0x971   : > { %v4011_v4 = vpop.eup %4010  ;;  %3726 = vmatprep.subr.bf16.mxu0 %v3725_v30  ;;  %v1326_v11 = vmul.f32 %v4009_v3, %v3997_v9  ;;  %v2061_v9 = vmul.f32 0.17677669, %v4769_v8 }
 0x972   : > { %v1325_v15 = vmul.f32 %v4011_v4, %v3999_v12 }
 0x973   : > { %v4013_v6 = vpop.eup %4012 }
 0x974   : > { %v4015_v16 = vpop.eup %4014  ;;  %3502 = vmatprep.mubr.msk.f32.mxu0 %vm742_vm3, %v1325_v15  ;;  %2442 = vadd.xlane.f32.xlu1 %v2441_v14  ;;  %v1521_v20 = vmul.f32 %v4013_v6, %v4003_v33  ;;  %v2535_v21 = vpop.permute.xlu0 %2534 }
 0x975   : > { %3503 = vmatmul.mubr.msk.f32.vlgmr.msra.gmra.mrb[16].mxu0 %vm742_vm3, %v1326_v11  ;;  %v1522_v22 = vmul.f32 %v4015_v16, %v4001_v18  ;;  %v2063_v18 = vsel %vm742_vm3, %v2061_v9, -inf }
 0x976   : > { %3728 = vmatpush3.bf16.msra.mxu0 %v3725_v30  ;;  %3516 = vmatprep.mubr.msk.f32.mxu0 %vm742_vm3, %v1521_v20 }
 0x977   : > { %3730 = vmatprep.subr.bf16.mxu0 %v4669_v19 }
 0x979   : > { %3517 = vmatmul.mubr.msk.f32.vlgmr.msra.gmra.mrb[18].mxu0 %vm742_vm3, %v1522_v22 }
 0x97a   : > { %3732 = vmatpush3.bf16.msra.mxu0 %v4669_v19 }
 0x97b   : > { %3734 = vmatprep.subr.bf16.mxu0 %v4679_v47 }
 0x97e   : > { %3736 = vmatpush3.bf16.msra.mxu0 %v4679_v47 }
 0x97f   : > { %3738 = vmatprep.subr.bf16.mxu0 %v4683_v0 }
 0x985   : > { %3958 = vrot.lane.b32.xlu1 %v4622_v54, %s4252_s28  ;;  %s4254_s28 = smov [#allocation10]  }
 0x9a5   : > { %v2068_v10 = vpop.xlane.xlu0 %2067 }
 0x9a6   : > { %v2070_v12 = vsub.f32 %v2062_v41, %v2068_v10 }
 0x9a8   : > { %v2073_v38 = vmul.f32 1.442695, %v2070_v12 }
 0x9a9   : > { %2064 = vmax.xlane.f32.xlu1 %v2063_v18 }
 0x9aa   : > { %4016 = vpow2.f32 %v2073_v38 }
 0x9b4   : > { %v4017_v13 = vpop.eup %4016 }
 0x9b5   : > { %v2078_v33 = vsel %vm742_vm3, %v4017_v13, 0.0 }
 0x9b6   : > { %2079 = vadd.xlane.f32.xlu1 %v2078_v33 }
 0x9fd   : > { %v2446_v34 = vpop.xlane.xlu1 %2445 }
 0x9fe   : > { %4018 = vrcp.f32 %v2446_v34 }
 0xa01   : > { %v2443_v36 = vpop.xlane.xlu1 %2442 }
 0xa02   : > { %4020 = vrcp.f32 %v2443_v36 }
 0xa05   : > { %v3959_v54 = vpop.permute.xlu1 %3958 }
 0xa06   : > { %v3961_v40 = vunpack.i.h.bf16 %v3959_v54  ;;  %v3960_v43 = vunpack.i.l.bf16 %v3959_v54 }
 0xa08   : > { %v3791_v45 = vpack.c.bf16 %v3961_v40, %v3960_v43  ;;  %v4019_v8 = vpop.eup %4018 }
 0xa09   : > { %v2450_v50 = vmul.f32 %v4019_v8, %v4005_v25  ;;  %v2902_v25 = vadd.f32 %v4825_v63, %v4713_v28 }
 0xa0a   : > { %3793 = vmatprep.subr.msk.bf16.mxu1 %vm4632_vm2, %v3791_v45 }
 0xa0c   : > { %v4021_v41 = vpop.eup %4020 }
 0xa0d   : > { %v2449_v46 = vmul.f32 %v4021_v41, %v4007_v29  ;;  %v4830_v29 = vadd.f32 %v2902_v25, %v4529_v49 }
 0xa0f   : > { %3602 = vmatprep.mubr.msk.f32.mxu1 %vm742_vm3, %v2449_v46  ;;  %v2918_v30 = vsel %vm317_vm0, %v4830_v29, 0.0 }
 0xa10   : > { %3603 = vmatmul.mubr.msk.f32.vlgmr.msra.gmra.mrb[30].mxu1 %vm742_vm3, %v2450_v50 }
 0xa11   : > { %3796 = vmatpush3.bf16.xpose.msk.msra.mxu1 %vm4632_vm2, %v3791_v45  ;;  %3609 = vmatprep.mubr.msk.f32.mxu1 %vm654_vm1, %v2533_v27 }
 0xa18   : > { %3610 = vmatmul.mubr.msk.f32.vlgmr.msra.gmra.mrb[32].mxu1 %vm654_vm1, %v2535_v21 }
 0xa36   : > { %v2065_v58 = vpop.xlane.xlu1 %2064 }
 0xa37   : > { %v2069_v57 = vsub.f32 %v2061_v9, %v2065_v58 }
 0xa39   : > { %v2071_v1 = vmul.f32 1.442695, %v2069_v57 }
 0xa3b   : > { %4022 = vpow2.f32 %v2071_v1 }
 0xa43   : > { %v2080_v35 = vpop.xlane.xlu1 %2079 }
 0xa44   : > { %4024 = vrcp.f32 %v2080_v35 }
 0xa45   : > { %v4023_v17 = vpop.eup %4022 }
 0xa46   : > { %v2075_v24 = vsel %vm742_vm3, %v4023_v17, 0.0 }
 0xa47   : > { %2076 = vadd.xlane.f32.xlu0 %v2075_v24 }
 0xa48   : > { %v3504_v26 = vpop.f32.mrb[16].mxu0 }
 0xa49   : > { %v1399_v42 = vpop.f32.mrb[17].mxu0 }
 0xa4c   : > { %v3518_v48 = vpop.f32.mrb[18].mxu0 }
 0xa4d   : > { %v1603_v32 = vpop.f32.mrb[19].mxu0 }
 0xa4e   : > { %3527 = vmatprep.mubr.msk.f32.mxu0 %vm654_vm1, %v1603_v32  ;;  %v4025_v15 = vpop.eup %4024 }
 0xa4f   : > { %3528 = vmatmul.mubr.msk.f32.vlgmr.msra.gmra.mrb[20].mxu0 %vm654_vm1, %v3518_v48  ;;  %v2084_v28 = vmul.f32 %v4025_v15, %v4017_v13 }
 0xa50   : > { %3740 = vmatpush3.bf16.msra.mxu0 %v4683_v0  ;;  %3538 = vmatprep.mubr.msk.f32.mxu0 %vm654_vm1, %v1399_v42 }
 0xa51   : > { %3742 = vmatprep.subr.bf16.mxu0 %v4686_v7 }
 0xa54   : > { %3744 = vmatpush3.bf16.msra.mxu0 %v4686_v7 }
 0xa57   : > { %3539 = vmatmul.mubr.msk.f32.vlgmr.msra.gmra.mrb[20].mxu0 %vm654_vm1, %v3504_v26 }
 0xa5d   : > { %3963 = vrot.lane.b32.xlu0 %v3962_v39, %s4253_s29 }
 0xa7c   : > { %2919 = vadd.xlane.f32.xlu0 %v2918_v30 }
 0xad4   : > { %v2077_v3 = vpop.xlane.xlu0 %2076 }
 0xad5   : > { %4026 = vrcp.f32 %v2077_v3 }
 0xad8   : > { %v3964_v31 = vpop.permute.xlu0 %3963 }
 0xad9   : > { %v3966_v37 = vunpack.i.h.bf16 %v3964_v31  ;;  %v3965_v39 = vunpack.i.l.bf16 %v3964_v31 }
 0xadb   : > { %v3761_v4 = vpack.c.bf16 %v3966_v37, %v3965_v39 }
 0xadd   : > { %3762 = vmatprep.subr.bf16.mxu0 %v3761_v4 }
 0xade   : > { %3764 = vmatpush3.bf16.msra.mxu0 %v3761_v4 }
 0xadf   : > { %v4027_v6 = vpop.eup %4026  ;;  %3766 = vmatprep.subr.bf16.mxu0 %v4669_v19 }
 0xae0   : > { %v2083_v49 = vmul.f32 %v4027_v6, %v4023_v17 }
 0xae2   : > { %3566 = vmatprep.mubr.msk.f32.mxu0 %vm742_vm3, %v2083_v49 }
 0xae3   : > { %3567 = vmatmul.mubr.msk.f32.vlgmr.msra.gmra.mrb[22].mxu0 %vm742_vm3, %v2084_v28  ;;  %v4837_v11 = vpop.f32.mrb[30].mxu1 }
 0xae4   : > { %v4839_v14 = vpop.f32.mrb[31].mxu1  ;;  %3768 = vmatpush3.bf16.msra.mxu0 %v4669_v19 }
 0xae5   : > { %3770 = vmatprep.subr.bf16.mxu0 %v4679_v47 }
 0xae8   : > { %3772 = vmatpush3.bf16.msra.mxu0 %v4679_v47 }
 0xae9   : > { %3774 = vmatprep.subr.bf16.mxu0 %v4683_v0 }
 0xaeb   : > { %v3611_v16 = vpop.f32.mrb[32].mxu1 }
 0xaec   : > { %v2614_v20 = vpop.f32.mrb[33].mxu1  ;;  %v2624_v27 = vmul.f32 0.17677669, %v3611_v16 }
 0xaed   : > { %v2623_v22 = vmul.f32 0.17677669, %v2614_v20 }
 0xaee   : > { %v2628_v9 = vsel %vm742_vm3, %v2624_v27, -inf }
 0xaef   : > { %v2625_v21 = vsel %vm742_vm3, %v2623_v22, -inf }
 0xaf0   : > { %2626 = vmax.xlane.f32.xlu1 %v2625_v21 }
 0xaf4   : > { %2629 = vmax.xlane.f32.xlu1 %v2628_v9 }
 0xb2a   : > { %v3540_v10 = vpop.f32.mrb[20].mxu0 }
 0xb2b   : > { %v1765_v12 = vpop.f32.mrb[21].mxu0  ;;  %v2905_v38 = vadd.f32 %v3540_v10, %v4825_v63 }
 0xb2c   : > { %v2904_v18 = vadd.f32 %v4825_v63, %v1765_v12 }
 0xb2d   : > { %v4855_v34 = vadd.f32 %v2905_v38, %v4539_v56 }
 0xb2e   : > { %v4850_v13 = vadd.f32 %v2904_v18, %v4537_v53 }
 0xb2f   : > { %v2927_v36 = vsel %vm317_vm0, %v4855_v34, 0.0 }
 0xb30   : > { %v2924_v33 = vsel %vm317_vm0, %v4850_v13, 0.0 }
 0xb31   : > { %2925 = vadd.xlane.f32.xlu0 %v2924_v33 }
 0xb35   : > { %2928 = vadd.xlane.f32.xlu0 %v2927_v36 }
 0xb7d   : > { %v2627_v54 = vpop.xlane.xlu1 %2626 }
 0xb7e   : > { %v2631_v40 = vsub.f32 %v2623_v22, %v2627_v54 }
 0xb80   : > { %v2633_v8 = vmul.f32 1.442695, %v2631_v40 }
 0xb81   : > { %v2630_v43 = vpop.xlane.xlu1 %2629 }
 0xb82   : > { %v2632_v45 = vsub.f32 %v2624_v27, %v2630_v43 }
 0xb84   : > { %v2635_v41 = vmul.f32 1.442695, %v2632_v45 }
 0xb86   : > { %4028 = vpow2.f32 %v2635_v41 }
 0xb87   : > { %4030 = vpow2.f32 %v2633_v8 }
 0xb90   : > { %v4029_v53 = vpop.eup %4028 }
 0xb91   : > { %v2640_v46 = vsel %vm742_vm3, %v4029_v53, 0.0  ;;  %v4031_v50 = vpop.eup %4030 }
 0xb92   : > { %2641 = vadd.xlane.f32.xlu1 %v2640_v46  ;;  %v2637_v56 = vsel %vm742_vm3, %v4031_v50, 0.0 }
 0xb96   : > { %2638 = vadd.xlane.f32.xlu1 %v2637_v56 }
 0xba7   : > { %3968 = vrot.lane.b32.xlu1 %v3967_v55, %s4253_s29  ;;  %v2921_v55 = vsel %vm317_vm0, %v2911_v51, 0.0  ;;  %s4170_s29 = sshll.u32 %s4254_s28, 4  ;;  %s4171_s29 = int_to_ptr.vmem [resolvable:$false] %s4170_s29 }
 0xba8   : > { %s4172_s9 = scalar_lea.vmem %s4171_s29, 2048  ;;  %p4173_p12 = scmp.lt.s32.totalorder %s4986_s7, %s4171_s29 }
 0xba9   : > { %p4174_p1 = scmp.lt.s32.totalorder %s4172_s9, %s4166_s30 }
 0xbab   : > { %p4175_p2 = por %p4174_p1, %p4173_p12 }
 0xbad   : > { %p4176_p4 = pnand %p4175_p2, %p4169_p7 }
 0xbb6   : > { %v3568_v58 = vpop.f32.mrb[22].mxu0 }
 0xbb7   : > { %v2165_v57 = vpop.f32.mrb[23].mxu0 }
 0xbb8   : > { %3577 = vmatprep.mubr.msk.f32.mxu0 %vm654_vm1, %v2165_v57 }
 0xbb9   : > { %3578 = vmatmul.mubr.msk.f32.vlgmr.msra.gmra.mrb[24].mxu0 %vm654_vm1, %v3568_v58 }
 0xbba   : > { %3776 = vmatpush3.bf16.msra.mxu0 %v4683_v0  ;;  %3588 = vmatprep.mubr.msk.f32.mxu0 %vm654_vm1, %v4767_v5 }
 0xbbb   : > { %3778 = vmatprep.subr.bf16.mxu0 %v4686_v7 }
 0xbbe   : > { %3780 = vmatpush3.bf16.msra.mxu0 %v4686_v7 }
 0xbc1   : > { %3589 = vmatmul.mubr.msk.f32.vlgmr.msra.gmra.mrb[24].mxu0 %vm654_vm1, %v4765_v2 }
 0xbcb   : > { %2922 = vadd.xlane.f32.xlu1 %v2921_v55 }
 0xc1f   : > { %v2642_v1 = vpop.xlane.xlu1 %2641 }
 0xc20   : > { %4032 = vrcp.f32 %v2642_v1 }
 0xc23   : > { %v2639_v17 = vpop.xlane.xlu1 %2638 }
 0xc24   : > { %4034 = vrcp.f32 %v2639_v17 }
 0xc27   : > { %v3969_v5 = vpop.permute.xlu1 %3968 }
 0xc28   : > { %v3971_v24 = vunpack.i.h.bf16 %v3969_v5  ;;  %v3970_v26 = vunpack.i.l.bf16 %v3969_v5 }
 0xc2a   : > { %v3797_v42 = vpack.c.bf16 %v3971_v24, %v3970_v26  ;;  %v4033_v48 = vpop.eup %4032 }
 0xc2b   : > { %v2646_v32 = vmul.f32 %v4033_v48, %v4029_v53 }
 0xc2c   : > { %3798 = vmatprep.subr.bf16.mxu0 %v3797_v42 }
 0xc2d   : > { %3800 = vmatpush3.bf16.msra.mxu0 %v3797_v42 }
 0xc2e   : > { %v4035_v2 = vpop.eup %4034  ;;  %3802 = vmatprep.subr.bf16.mxu0 %v4669_v19 }
 0xc2f   : > { %v2645_v23 = vmul.f32 %v4035_v2, %v4031_v50 }
 0xc31   : > { %3616 = vmatprep.mubr.msk.f32.mxu0 %vm742_vm3, %v2645_v23 }
 0xc32   : > { %3617 = vmatmul.mubr.msk.f32.vlgmr.msra.gmra.mrb[26].mxu0 %vm742_vm3, %v2646_v32 }
 0xc33   : > { %3804 = vmatpush3.bf16.msra.mxu0 %v4669_v19 }
 0xc34   : > { %3806 = vmatprep.subr.bf16.mxu0 %v4679_v47 }
 0xc37   : > { %3808 = vmatpush3.bf16.msra.mxu0 %v4679_v47 }
 0xc38   : > { %3810 = vmatprep.subr.bf16.mxu0 %v4683_v0 }
 0xc58   : > { %v2923_v15 = vpop.xlane.xlu1 %2922 }
 0xc59   : > { %v2944_v6 = vmul.f32 0.015625, %v2923_v15  ;;  %v3273_v15 = vld [vmem:[%s5038_s4 + $0x5] ss:$0 sm:$0xff] }
 0xc94   : > { %v3590_v52 = vpop.f32.mrb[24].mxu0 }
 0xc95   : > { %v2907_v25 = vadd.f32 %v3590_v52, %v4825_v63  ;;  %v2327_v30 = vpop.f32.mrb[25].mxu0 }
 0xc96   : > { %v2906_v35 = vadd.f32 %v4825_v63, %v2327_v30 }
 0xc97   : > { %v2915_v3 = vadd.f32 %v2907_v25, %v4547_v60 }
 0xc98   : > { %v2914_v37 = vadd.f32 %v2906_v35, %v4545_v59  ;;  %v2920_v59 = vpop.xlane.xlu0 %2919 }
 0xc99   : > { %v2933_v31 = vsel %vm317_vm0, %v2915_v3, 0.0  ;;  %v2943_v28 = vmul.f32 0.015625, %v2920_v59 }
 0xc9a   : > { %2934 = vadd.xlane.f32.xlu0 %v2933_v31  ;;  %v2930_v19 = vsel %vm317_vm0, %v2914_v37, 0.0 }
 0xc9b   : > { %v4904_v27 = vsub.f32 %v4830_v29, %v2943_v28  ;;  %v3274_v28 = vld [vmem:[%s5038_s4 + $0x6] ss:$0 sm:$0xff] }
 0xc9c   : > { %v2926_v60 = vpop.xlane.xlu0 %2925 }
 0xc9e   : > { %2931 = vadd.xlane.f32.xlu0 %v2930_v19 }
 0xca0   : > { %v2929_v4 = vpop.xlane.xlu0 %2928 }
 0xca1   : > { %v2946_v20 = vmul.f32 0.015625, %v2929_v4 }
 0xca3   : > { %v4910_v12 = vsub.f32 %v4855_v34, %v2946_v20 }
 0xca5   : > { %v2962_v54 = vmul.f32 %v4910_v12, %v4910_v12 }
 0xca7   : > { %v2976_v45 = vsel %vm317_vm0, %v2962_v54, 0.0 }
 0xd05   : > { %v3618_v39 = vpop.f32.mrb[26].mxu0 }
 0xd06   : > { %v2727_v47 = vpop.f32.mrb[27].mxu0 }
 0xd07   : > { %3627 = vmatprep.mubr.msk.f32.mxu0 %vm654_vm1, %v2727_v47 }
 0xd08   : > { %3628 = vmatmul.mubr.msk.f32.vlgmr.msra.gmra.mrb[28].mxu0 %vm654_vm1, %v3618_v39 }
 0xd09   : > { %3812 = vmatpush3.bf16.msra.mxu0 %v4683_v0  ;;  %3638 = vmatprep.mubr.msk.f32.mxu0 %vm654_vm1, %v4839_v14  ;;  %v4900_v0 = vsub.f32 %v2911_v51, %v2944_v6 }
 0xd0a   : > { %3814 = vmatprep.subr.bf16.mxu0 %v4686_v7 }
 0xd0b   : > { %v2960_v33 = vmul.f32 %v4900_v0, %v4900_v0 }
 0xd0d   : > { %3816 = vmatpush3.bf16.msra.mxu0 %v4686_v7  ;;  %v2945_v7 = vmul.f32 0.015625, %v2926_v60  ;;  %v2970_v34 = vsel %vm317_vm0, %v2960_v33, 0.0 }
 0xd0f   : > { %v4916_v29 = vsub.f32 %v4850_v13, %v2945_v7 }
 0xd10   : > { %3639 = vmatmul.mubr.msk.f32.vlgmr.msra.gmra.mrb[28].mxu0 %vm654_vm1, %v4837_v11 }
 0xd11   : > { %v2961_v43 = vmul.f32 %v4916_v29, %v4916_v29 }
 0xd13   : > { %v2973_v41 = vsel %vm317_vm0, %v2961_v43, 0.0 }
 0xd27   : > { %v2935_v49 = vpop.xlane.xlu0 %2934 }
 0xd28   : > { %v2948_v38 = vmul.f32 0.015625, %v2935_v49 }
 0xd2b   : > { %v2932_v21 = vpop.xlane.xlu0 %2931 }
 0xd2c   : > { %v2947_v36 = vmul.f32 0.015625, %v2932_v21 }
 0xd2e   : > { %v4926_v40 = vsub.f32 %v2914_v37, %v2947_v36 }
 0xd30   : > { %v2963_v53 = vmul.f32 %v4926_v40, %v4926_v40 }
 0xd32   : > { %v2979_v50 = vsel %vm317_vm0, %v2963_v53, 0.0 }
 0xde3   : > { %v3640_v16 = vpop.f32.mrb[28].mxu0 }
 0xde4   : > { %v2909_v14 = vadd.f32 %v3640_v16, %v4825_v63  ;;  %v2889_v22 = vpop.f32.mrb[29].mxu0 }
 0xde5   : > { %v2908_v11 = vadd.f32 %v4825_v63, %v2889_v22 }
 0xde6   : > { %v2917_v9 = vadd.f32 %v2909_v14, %v4555_v62  ;;  %v2959_v62 = vmul.f32 %v4904_v27, %v4904_v27 }
 0xde7   : > { %v2916_v10 = vadd.f32 %v2908_v11, %v4553_v61  ;;  %v4921_v61 = vsub.f32 %v2915_v3, %v2948_v38 }
 0xde8   : > { %v2939_v18 = vsel %vm317_vm0, %v2917_v9, 0.0  ;;  %v2967_v13 = vsel %vm317_vm0, %v2959_v62, 0.0 }
 0xde9   : > { %2940 = vadd.xlane.f32.xlu1 %v2939_v18  ;;  %v2936_v63 = vsel %vm317_vm0, %v2916_v10, 0.0  ;;  %v2964_v8 = vmul.f32 %v4921_v61, %v4921_v61 }
 0xdea   : > { %2937 = vadd.xlane.f32.xlu0 %v2936_v63 }
 0xdeb   : > { %v2982_v46 = vsel %vm317_vm0, %v2964_v8, 0.0 }
 0xded   : > { %2971 = vadd.xlane.f32.xlu1 %v2970_v34 }
 0xdee   : > { %2968 = vadd.xlane.f32.xlu0 %v2967_v13 }
 0xdf1   : > { %2977 = vadd.xlane.f32.xlu1 %v2976_v45 }
 0xdf2   : > { %2974 = vadd.xlane.f32.xlu0 %v2973_v41 }
 0xdf5   : > { %2983 = vadd.xlane.f32.xlu1 %v2982_v46 }
 0xdf6   : > { %2980 = vadd.xlane.f32.xlu0 %v2979_v50 }
 0xe76   : > { %v2941_v56 = vpop.xlane.xlu1 %2940 }
 0xe77   : > { %v2950_v58 = vmul.f32 0.015625, %v2941_v56  ;;  %v2938_v57 = vpop.xlane.xlu0 %2937 }
 0xe78   : > { %v2949_v44 = vmul.f32 0.015625, %v2938_v57 }
 0xe79   : > { %v4939_v51 = vsub.f32 %v2917_v9, %v2950_v58 }
 0xe7a   : > { %v4941_v55 = vsub.f32 %v2916_v10, %v2949_v44  ;;  %v2972_v1 = vpop.xlane.xlu1 %2971 }
 0xe7b   : > { %v2992_v17 = vmul.f32 0.015625, %v2972_v1  ;;  %v2969_v5 = vpop.xlane.xlu0 %2968  ;;  %v2966_v24 = vmul.f32 %v4939_v51, %v4939_v51 }
 0xe7c   : > { %v2991_v26 = vmul.f32 0.015625, %v2969_v5  ;;  %v2965_v42 = vmul.f32 %v4941_v55, %v4941_v55 }
 0xe7d   : > { %v3000_v48 = vadd.f32 1e-05, %v2992_v17  ;;  %v2988_v2 = vsel %vm317_vm0, %v2966_v24, 0.0 }
 0xe7e   : > { %v2999_v23 = vadd.f32 1e-05, %v2991_v26  ;;  %2989 = vadd.xlane.f32.xlu1 %v2988_v2  ;;  %v2978_v32 = vpop.xlane.xlu1 %2977  ;;  %v2985_v52 = vsel %vm317_vm0, %v2965_v42, 0.0 }
 0xe7f   : > { %4036 = vrsqrt.f32 %v3000_v48  ;;  %v2994_v25 = vmul.f32 0.015625, %v2978_v32  ;;  %2986 = vadd.xlane.f32.xlu0 %v2985_v52  ;;  %v2975_v30 = vpop.xlane.xlu0 %2974 }
 0xe80   : > { %4038 = vrsqrt.f32 %v2999_v23  ;;  %v2993_v35 = vmul.f32 0.015625, %v2975_v30 }
 0xe81   : > { %v3002_v3 = vadd.f32 1e-05, %v2994_v25 }
 0xe82   : > { %v3001_v31 = vadd.f32 1e-05, %v2993_v35  ;;  %v2984_v37 = vpop.xlane.xlu1 %2983 }
 0xe83   : > { %4040 = vrsqrt.f32 %v3002_v3  ;;  %v2996_v19 = vmul.f32 0.015625, %v2984_v37  ;;  %v2981_v39 = vpop.xlane.xlu0 %2980 }
 0xe84   : > { %4042 = vrsqrt.f32 %v3001_v31  ;;  %v2995_v47 = vmul.f32 0.015625, %v2981_v39 }
 0xe85   : > { %v3004_v59 = vadd.f32 1e-05, %v2996_v19 }
 0xe86   : > { %v3003_v60 = vadd.f32 1e-05, %v2995_v47 }
 0xe87   : > { %4044 = vrsqrt.f32 %v3004_v59 }
 0xe88   : > { %4046 = vrsqrt.f32 %v3003_v60 }
 0xe89   : > { %v4037_v4 = vpop.eup %4036 }
 0xe8a   : > { %v4039_v6 = vpop.eup %4038  ;;  %v3016_v49 = vmul.f32 %v4037_v4, %v4900_v0 }
 0xe8b   : > { %v3015_v16 = vmul.f32 %v4039_v6, %v4904_v27 }
 0xe8c   : > { %v3028_v20 = vmul.f32 %v3273_v15, %v3016_v49 }
 0xe8d   : > { %v4041_v14 = vpop.eup %4040  ;;  %v3027_v22 = vmul.f32 %v3273_v15, %v3015_v16 }
 0xe8e   : > { %v4043_v7 = vpop.eup %4042  ;;  %v3040_v11 = vadd.f32 %v3274_v28, %v3028_v20  ;;  %v3018_v21 = vmul.f32 %v4041_v14, %v4910_v12 }
 0xe8f   : > { %v3039_v9 = vadd.f32 %v3274_v28, %v3027_v22  ;;  %v3017_v10 = vmul.f32 %v4043_v7, %v4916_v29 }
 0xe90   : > { %3048 = vst.msk [vmem:[%s4961_s15 + $0x8] sm:$0xff] %vm317_vm0, %v3040_v11  ;;  %v3030_v0 = vmul.f32 %v3273_v15, %v3018_v21 }
 0xe91   : > { %v4045_v27 = vpop.eup %4044  ;;  %3047 = vst.msk [vmem:[%s4961_s15] sm:$0xff] %vm317_vm0, %v3039_v9  ;;  %v3029_v38 = vmul.f32 %v3273_v15, %v3017_v10 }
 0xe92   : > { %v4047_v12 = vpop.eup %4046  ;;  %v3042_v18 = vadd.f32 %v3274_v28, %v3030_v0  ;;  %v3020_v33 = vmul.f32 %v4045_v27, %v4921_v61 }
 0xe93   : > { %v3041_v29 = vadd.f32 %v3274_v28, %v3029_v38  ;;  %v3019_v36 = vmul.f32 %v4047_v12, %v4926_v40 }
 0xe94   : > { %3050 = vst.msk [vmem:[%s4961_s15 + $0x18] sm:$0xff] %vm317_vm0, %v3042_v18  ;;  %v3032_v63 = vmul.f32 %v3273_v15, %v3020_v33 }
 0xe95   : > { %3049 = vst.msk [vmem:[%s4961_s15 + $0x10] sm:$0xff] %vm317_vm0, %v3041_v29  ;;  %v3031_v62 = vmul.f32 %v3273_v15, %v3019_v36 }
 0xe96   : > { %v3044_v34 = vadd.f32 %v3274_v28, %v3032_v63 }
 0xe97   : > { %v3043_v54 = vadd.f32 %v3274_v28, %v3031_v62 }
 0xe98   : > { %3052 = vst.msk [vmem:[%s4961_s15 + $0x28] sm:$0xff] %vm317_vm0, %v3044_v34 }
 0xe99   : > { %3051 = vst.msk [vmem:[%s4961_s15 + $0x20] sm:$0xff] %vm317_vm0, %v3043_v54 }
 0xf0b   : > { %v2990_v13 = vpop.xlane.xlu1 %2989 }
 0xf0c   : > { %v2998_v43 = vmul.f32 0.015625, %v2990_v13  ;;  %v2987_v61 = vpop.xlane.xlu0 %2986 }
 0xf0d   : > { %v2997_v45 = vmul.f32 0.015625, %v2987_v61 }
 0xf0e   : > { %v3006_v8 = vadd.f32 1e-05, %v2998_v43 }
 0xf0f   : > { %v3005_v40 = vadd.f32 1e-05, %v2997_v45 }
 0xf10   : > { %4048 = vrsqrt.f32 %v3006_v8 }
 0xf11   : > { %4050 = vrsqrt.f32 %v3005_v40 }
 0xf1a   : > { %v4049_v41 = vpop.eup %4048 }
 0xf1b   : > { %v4051_v53 = vpop.eup %4050  ;;  %v3022_v46 = vmul.f32 %v4049_v41, %v4939_v51 }
 0xf1c   : > { %v3021_v50 = vmul.f32 %v4051_v53, %v4941_v55 }
 0xf1d   : > { %v3034_v56 = vmul.f32 %v3273_v15, %v3022_v46 }
 0xf1e   : > { %v3033_v58 = vmul.f32 %v3273_v15, %v3021_v50 }
 0xf1f   : > { %v3046_v57 = vadd.f32 %v3274_v28, %v3034_v56 }
 0xf20   : > { %v3045_v44 = vadd.f32 %v3274_v28, %v3033_v58 }
 0xf21   : > { %3054 = vst.msk [vmem:[%s4961_s15 + $0x38] sm:$0xff] %vm317_vm0, %v3046_v57 }
 0xf22   : > { %3053 = vst.msk [vmem:[%s4961_s15 + $0x30] sm:$0xff] %vm317_vm0, %v3045_v44 }
 0xf23   : > { %4179 = shalt.err (!%p4176_p4)
}
 0xf24   : > { %s4180_s11 = scalar_lea.hbm %s4984_s13, 1024  ;;  %s4184_s26 = scalar_lea.hbm %s5039_s5, 2048 }
 0xf25   : > { %p4181_p9 = scmp.ne.s32.totalorder %s4984_s13, %s4180_s11  ;;  %p4185_p8 = scmp.lt.u32.totalorder %s4984_s13, %s5039_s5 }
 0xf26   : > { %p4186_p13 = scmp.lt.u32.totalorder %s4184_s26, %s4180_s11  ;;  %p4188_p10 = scmp.lt.u32.totalorder %s4180_s11, %s4984_s13 }
 0xf27   : > { %p4182_p0 = pnand %p4181_p9, %p4435_p5 }
 0xf28   : > { %p4187_p6 = por %p4186_p13, %p4185_p8 }
 0xf29   : > { %p4183_p11 = pneg %p4182_p0 }
 0xf2a   : > { %p4189_p3 = por %p4188_p10, %p4187_p6 }
 0xf2c   : > { %p4190_p7 = pnand %p4189_p3, %p4183_p11 }
 0xf2e   : > { %4193 = shalt.err (!%p4190_p7)
}
 0xf2f   : > { %s4255_s10 = smov 128   ;;  %s4256_s6 = smov 8  }
 0xf30   : > { %3839 = dma.vmem_to_hbm [thread:$0]  (%p4435_p5), %s4986_s7, 1024, %s4984_s13, %s3056_s22, %s4255_s10, %s4255_s10, %s4256_s6  }
 0xf31 PF: > { %s3085_s17 = sand.u32 1, %s4228_s18   ;;  %p5065_p12 = scmp.ne.s32.totalorder %s5048_s25, 0 }
 0xf32   : > { %p5066_p1 = scmp.ge.s32.totalorder %s4240_s21, 2  ;;  %s3086_s30 = scalar_lea.sflag [#allocation4], %s3085_s17 }
 0xf34   : > { %p3856_p2 = pnand %p5066_p1, %p5065_p12 }
 0xf36   : > { %4223 = dma.done.wait (!%p3856_p2), %s3086_s30, 1024  }
 0xf37   : > { %4225 = vsyncadd (!%p3856_p2), %s3086_s30, 4294966272  ;;  %p20_p4 = scmp.ge.s32.totalorder %s4400_s8, 4   ;;  %s5067_s18 = smov %s4232_s19 }
 0xf38   : > { %s5068_s19 = smov %s4236_s20  ;;  %s5069_s20 = smov %s4431_s23 }
 0xf39   : > { %s5070_s21 = smov %s4400_s8  ;;  %22 = sbr.rel (!%p20_p4) target bundleno = 7 (0x7), region = 97 }
 0xf40   :  { %3091 = vsyncpa [#allocation3], 1 }
 0xf41   :  { %3093 = vsyncpa [#allocation3 + $0x1], 1 }
 0xf42   :  { %3094 = vsyncpa [#allocation6], 1 }
 0xf43   :  { %3095 = vsyncpa [#allocation9], 1 }
 0xf44   :  { %3096 = vsyncpa [#allocation4], 1 }
 0xf45   :  { %3098 = vsyncpa [#allocation4 + $0x1], 1 }

</bundles_post_ra>
